<compile_context>
chip_gen: v5e
topology: v5e:2x2
jax: 0.10.0
libtpu: 0.0.40
codegen_flags: <defaults>
</compile_context>

<pallas_src>
import functools

import jax
import jax.numpy as jnp
from jax import lax
from jax.experimental import pallas as pl
from jax.experimental.pallas import tpu as pltpu


def _gelu_tanh(x):
    # TODO(synk): F.gelu defaults to the exact erf form; the tanh approximation
    # is used because erf has no guaranteed Mosaic lowering (diff ~1e-3).
    c = 0.7978845608028654  # sqrt(2 / pi)
    return 0.5 * x * (1.0 + jnp.tanh(c * (x + 0.044715 * x * x * x)))


def _gated_ffn_kernel(x_ref, w_in_ref, w_dw_ref, w_out_ref, o_ref, ybuf,
                      *, H, W, hidden, pad):
    HW = H * W
    h2 = 2 * hidden

    x = x_ref[0].astype(jnp.float32)                                 # (dim, HW)
    w_in = w_in_ref[...].astype(jnp.float32)                         # (2h, dim)

    # project_in: 1x1 conv == channel matmul (MXU).
    y = jnp.dot(w_in, x, preferred_element_type=jnp.float32)         # (2h, HW)

    # Stage y in a lane-padded scratch so every depthwise tap is a static
    # slice; the zero pads provide the top/bottom image borders.
    ybuf[:, :pad] = jnp.zeros((h2, pad), jnp.float32)
    ybuf[:, pad + HW:] = jnp.zeros((h2, pad), jnp.float32)
    ybuf[:, pad:pad + HW] = y

    # Per-column validity masks for the left/right image borders.
    col = lax.broadcasted_iota(jnp.int32, (1, HW), 1) % W
    mask_m1 = (col >= 1).astype(jnp.float32)       # tap reads column w-1
    mask_p1 = (col <= W - 2).astype(jnp.float32)   # tap reads column w+1

    # Depthwise 3x3 conv: 9 shifted taps, each weighted per-channel.
    acc = jnp.zeros((h2, HW), jnp.float32)
    t = 0
    for dh in (-1, 0, 1):
        for dw in (-1, 0, 1):
            s = dh * W + dw
            tap = ybuf[:, pad + s: pad + s + HW]                     # (2h, HW)
            if dw == -1:
                tap = tap * mask_m1
            elif dw == 1:
                tap = tap * mask_p1
            k = w_dw_ref[:, t:t + 1].astype(jnp.float32)             # (2h, 1)
            acc = acc + tap * k
            t += 1

    # Gated activation.
    x1 = acc[:hidden, :]
    x2 = acc[hidden:, :]
    gated = _gelu_tanh(x1) * x2                                      # (h, HW)

    # project_out: 1x1 conv == channel matmul (MXU).
    w_out = w_out_ref[...].astype(jnp.float32)                       # (dim, h)
    out = jnp.dot(w_out, gated, preferred_element_type=jnp.float32)  # (dim, HW)
    o_ref[0] = out.astype(o_ref.dtype)


def gated_feed_forward(x, w_in, w_dw, w_out):
    """x: (N, dim, H, W); w_in: (2*hidden, dim); w_dw: (2*hidden, 3, 3);
    w_out: (dim, hidden). bias=False (module default). Returns (N, dim, H, W)."""
    n, dim, h, w = x.shape
    hw = h * w
    h2 = w_in.shape[0]
    hidden = h2 // 2

    x3 = x.reshape(n, dim, hw)                 # free reshape, no transpose
    w_dw2 = w_dw.reshape(h2, 9)
    pad = ((w + 1 + 127) // 128) * 128         # >= W+1, lane-aligned

    kernel = functools.partial(_gated_ffn_kernel, H=h, W=w,
                               hidden=hidden, pad=pad)

    flops = 2 * n * hw * (dim * h2 + 9 * h2 + hidden * dim)
    transcendentals = n * hw * hidden
    bytes_accessed = 4 * (2 * n * dim * hw + w_in.size + w_dw.size + w_out.size)

    out3 = pl.pallas_call(
        kernel,
        out_shape=jax.ShapeDtypeStruct((n, dim, hw), x.dtype),
        grid_spec=pltpu.PrefetchScalarGridSpec(
            num_scalar_prefetch=0,
            grid=(n,),
            in_specs=[
                pl.BlockSpec((1, dim, hw), lambda b: (b, 0, 0)),
                pl.BlockSpec((h2, dim), lambda b: (0, 0)),
                pl.BlockSpec((h2, 9), lambda b: (0, 0)),
                pl.BlockSpec((dim, hidden), lambda b: (0, 0)),
            ],
            out_specs=pl.BlockSpec((1, dim, hw), lambda b: (b, 0, 0)),
            scratch_shapes=[pltpu.VMEM((h2, hw + 2 * pad), jnp.float32)],
        ),
        compiler_params=pltpu.CompilerParams(
            dimension_semantics=("parallel",),
            vmem_limit_bytes=32 * 1024 * 1024,   # safe on v5e/v6e/v7x
        ),
        cost_estimate=pl.CostEstimate(
            flops=flops,
            transcendentals=transcendentals,
            bytes_accessed=bytes_accessed),
    )(x3, w_in, w_dw2, w_out)

    return out3.reshape(n, dim, h, w)


def _reference(x, w_in, w_dw, w_out):
    """Pure-JAX reference matching the PyTorch forward (tanh-GELU variant)."""
    n, dim, h, w = x.shape
    h2 = w_in.shape[0]
    hidden = h2 // 2
    y = jnp.einsum('nchw,oc->nohw', x, w_in, precision=lax.Precision.HIGHEST)
    yp = jnp.pad(y, ((0, 0), (0, 0), (1, 1), (1, 1)))
    z = jnp.zeros_like(y)
    for dh in range(3):
        for dw in range(3):
            z = z + yp[:, :, dh:dh + h, dw:dw + w] * \
                w_dw[None, :, dh, dw, None, None]
    x1, x2 = z[:, :hidden], z[:, hidden:]
    gated = _gelu_tanh(x1) * x2
    return jnp.einsum('nchw,oc->nohw', gated, w_out,
                      precision=lax.Precision.HIGHEST)


if __name__ == "__main__":
    key = jax.random.PRNGKey(0)
    k_x, k_in, k_dw, k_out = jax.random.split(key, 4)

    n, dim, h, w = 2, 32, 16, 16
    mult = 1
    hidden = int(dim * mult)
    h2 = 2 * hidden

    x = jax.random.normal(k_x, (n, dim, h, w), dtype=jnp.float32)
    # Conv weights (bias=False, matching module defaults).
    w_in = jax.random.normal(k_in, (h2, dim), dtype=jnp.float32) / (dim ** 0.5)
    w_dw = jax.random.normal(k_dw, (h2, 3, 3), dtype=jnp.float32) / 3.0
    w_out = jax.random.normal(k_out, (dim, hidden), dtype=jnp.float32) / (hidden ** 0.5)

    out = gated_feed_forward(x, w_in, w_dw, w_out)
    out = jax.block_until_ready(out)

    ref = _reference(x, w_in, w_dw, w_out)
    assert out.shape == (n, dim, h, w)
    err = float(jnp.max(jnp.abs(out - ref)))
    assert err < 2e-3, f"max abs err {err}"

    print("KERNEL_OK")
</pallas_src>

<mosaic_0001>
module attributes {stable_mosaic.version = 11 : i64} {
  func.func @_gated_ffn_kernel(%arg0: i32, %arg1: memref<1x32x256xf32, #tpu.memory_space<vmem>>, %arg2: memref<64x32xf32, #tpu.memory_space<vmem>>, %arg3: memref<64x9xf32, #tpu.memory_space<vmem>>, %arg4: memref<32x32xf32, #tpu.memory_space<vmem>>, %arg5: memref<1x32x256xf32, #tpu.memory_space<vmem>>, %arg6: memref<64x512xf32, #tpu.memory_space<vmem>>) attributes {dimension_semantics = [#tpu.dimension_semantics<parallel>], iteration_bounds = array<i64: 2>, scalar_prefetch = 0 : i64, scratch_operands = 1 : i64, tpu.core_type = #tpu.core_type<tc>, window_params = [{transform_indices = @transform_0, window_bounds = array<i64: 1, 32, 256>}, {pipeline_mode = #tpu.pipeline_mode<synchronous>, transform_indices = @transform_1, window_bounds = array<i64: 64, 32>}, {pipeline_mode = #tpu.pipeline_mode<synchronous>, transform_indices = @transform_2, window_bounds = array<i64: 64, 9>}, {pipeline_mode = #tpu.pipeline_mode<synchronous>, transform_indices = @transform_3, window_bounds = array<i64: 32, 32>}, {transform_indices = @transform_4, window_bounds = array<i64: 1, 32, 256>}]} {
    %c0 = arith.constant 0 : index
    %c0_0 = arith.constant 0 : index
    %c0_1 = arith.constant 0 : index
    %0 = vector.load %arg1[%c0, %c0_0, %c0_1] : memref<1x32x256xf32, #tpu.memory_space<vmem>>, vector<1x32x256xf32>
    %1 = vector.shape_cast %0 : vector<1x32x256xf32> to vector<32x256xf32>
    %c0_2 = arith.constant 0 : index
    %c0_3 = arith.constant 0 : index
    %2 = vector.load %arg2[%c0_2, %c0_3] : memref<64x32xf32, #tpu.memory_space<vmem>>, vector<64x32xf32>
    %cst = arith.constant dense<0.000000e+00> : vector<64x256xf32>
    %3 = tpu.matmul %2, %1, %cst {dimension_numbers = #tpu.dot_dimension_numbers<[1], [0], [0], [1], [0, 0, 1, 1], [], []>} : vector<64x32xf32>, vector<32x256xf32>, vector<64x256xf32> -> vector<64x256xf32>
    %cst_4 = arith.constant 0.000000e+00 : f32
    %4 = vector.broadcast %cst_4 : f32 to vector<64x128xf32>
    %c0_5 = arith.constant 0 : index
    %c0_6 = arith.constant 0 : index
    %5 = vector.load %arg6[%c0_5, %c0_6] : memref<64x512xf32, #tpu.memory_space<vmem>>, vector<64x128xf32>
    tpu.vector_store %arg6[%c0_5, %c0_6], %4 {strides = array<i32>} : memref<64x512xf32, #tpu.memory_space<vmem>>, vector<64x128xf32>,
    %cst_7 = arith.constant 0.000000e+00 : f32
    %6 = vector.broadcast %cst_7 : f32 to vector<64x128xf32>
    %c0_8 = arith.constant 0 : index
    %c384 = arith.constant 384 : index
    %7 = vector.load %arg6[%c0_8, %c384] : memref<64x512xf32, #tpu.memory_space<vmem>>, vector<64x128xf32>
    tpu.vector_store %arg6[%c0_8, %c384], %6 {strides = array<i32>} : memref<64x512xf32, #tpu.memory_space<vmem>>, vector<64x128xf32>,
    %c0_9 = arith.constant 0 : index
    %c128 = arith.constant 128 : index
    %8 = vector.load %arg6[%c0_9, %c128] : memref<64x512xf32, #tpu.memory_space<vmem>>, vector<64x256xf32>
    tpu.vector_store %arg6[%c0_9, %c128], %3 {strides = array<i32>} : memref<64x512xf32, #tpu.memory_space<vmem>>, vector<64x256xf32>,
    %9 = tpu.iota {dimensions = array<i32: 1>} : vector<1x256xi32>
    %c16_i32 = arith.constant 16 : i32
    %c0_i32 = arith.constant 0 : i32
    %10 = arith.cmpi eq, %c16_i32, %c0_i32 : i32
    %c1_i32 = arith.constant 1 : i32
    %11 = arith.select %10, %c1_i32, %c16_i32 : i32
    %12 = vector.broadcast %11 : i32 to vector<1x256xi32>
    %13 = arith.remsi %9, %12 : vector<1x256xi32>
    %c0_i32_10 = arith.constant 0 : i32
    %14 = vector.broadcast %c0_i32_10 : i32 to vector<1x256xi32>
    %15 = arith.cmpi ne, %13, %14 : vector<1x256xi32>
    %c0_i32_11 = arith.constant 0 : i32
    %16 = vector.broadcast %c0_i32_11 : i32 to vector<1x256xi32>
    %17 = arith.cmpi slt, %13, %16 : vector<1x256xi32>
    %c0_i32_12 = arith.constant 0 : i32
    %18 = arith.cmpi slt, %11, %c0_i32_12 : i32
    %19 = vector.broadcast %18 : i1 to vector<1x256xi1>
    %20 = vector.broadcast %19 : vector<1x256xi1> to vector<1x256xi1>
    %21 = arith.xori %17, %20 : vector<1x256xi1>
    %22 = arith.andi %21, %15 : vector<1x256xi1>
    %23 = vector.broadcast %11 : i32 to vector<1x256xi32>
    %24 = arith.addi %13, %23 : vector<1x256xi32>
    %25 = arith.select %22, %24, %13 : vector<1x256xi1>, vector<1x256xi32>
    %c1_i32_13 = arith.constant 1 : i32
    %26 = vector.broadcast %c1_i32_13 : i32 to vector<1x256xi32>
    %27 = arith.cmpi sge, %25, %26 : vector<1x256xi32>
    %28 = arith.extui %27 : vector<1x256xi1> to vector<1x256xi32>
    %29 = arith.sitofp %28 : vector<1x256xi32> to vector<1x256xf32>
    %c14_i32 = arith.constant 14 : i32
    %30 = vector.broadcast %c14_i32 : i32 to vector<1x256xi32>
    %31 = arith.cmpi sle, %25, %30 : vector<1x256xi32>
    %32 = arith.extui %31 : vector<1x256xi1> to vector<1x256xi32>
    %33 = arith.sitofp %32 : vector<1x256xi32> to vector<1x256xf32>
    %cst_14 = arith.constant 0.000000e+00 : f32
    %34 = vector.broadcast %cst_14 : f32 to vector<64x256xf32>
    %c0_15 = arith.constant 0 : index
    %c111 = arith.constant 111 : index
    %35 = vector.load %arg6[%c0_15, %c111] : memref<64x512xf32, #tpu.memory_space<vmem>>, vector<64x256xf32>
    %36 = vector.broadcast %29 : vector<1x256xf32> to vector<64x256xf32>
    %37 = arith.mulf %35, %36 : vector<64x256xf32>
    %c0_16 = arith.constant 0 : index
    %c0_17 = arith.constant 0 : index
    %38 = vector.load %arg3[%c0_16, %c0_17] : memref<64x9xf32, #tpu.memory_space<vmem>>, vector<64x1xf32>
    %39 = vector.broadcast %38 : vector<64x1xf32> to vector<64x256xf32>
    %40 = arith.mulf %37, %39 : vector<64x256xf32>
    %41 = arith.addf %34, %40 : vector<64x256xf32>
    %c0_18 = arith.constant 0 : index
    %c112 = arith.constant 112 : index
    %42 = vector.load %arg6[%c0_18, %c112] : memref<64x512xf32, #tpu.memory_space<vmem>>, vector<64x256xf32>
    %c0_19 = arith.constant 0 : index
    %c1 = arith.constant 1 : index
    %43 = vector.load %arg3[%c0_19, %c1] : memref<64x9xf32, #tpu.memory_space<vmem>>, vector<64x1xf32>
    %44 = vector.broadcast %43 : vector<64x1xf32> to vector<64x256xf32>
    %45 = arith.mulf %42, %44 : vector<64x256xf32>
    %46 = arith.addf %41, %45 : vector<64x256xf32>
    %c0_20 = arith.constant 0 : index
    %c113 = arith.constant 113 : index
    %47 = vector.load %arg6[%c0_20, %c113] : memref<64x512xf32, #tpu.memory_space<vmem>>, vector<64x256xf32>
    %48 = vector.broadcast %33 : vector<1x256xf32> to vector<64x256xf32>
    %49 = arith.mulf %47, %48 : vector<64x256xf32>
    %c0_21 = arith.constant 0 : index
    %c2 = arith.constant 2 : index
    %50 = vector.load %arg3[%c0_21, %c2] : memref<64x9xf32, #tpu.memory_space<vmem>>, vector<64x1xf32>
    %51 = vector.broadcast %50 : vector<64x1xf32> to vector<64x256xf32>
    %52 = arith.mulf %49, %51 : vector<64x256xf32>
    %53 = arith.addf %46, %52 : vector<64x256xf32>
    %c0_22 = arith.constant 0 : index
    %c127 = arith.constant 127 : index
    %54 = vector.load %arg6[%c0_22, %c127] : memref<64x512xf32, #tpu.memory_space<vmem>>, vector<64x256xf32>
    %55 = vector.broadcast %29 : vector<1x256xf32> to vector<64x256xf32>
    %56 = arith.mulf %54, %55 : vector<64x256xf32>
    %c0_23 = arith.constant 0 : index
    %c3 = arith.constant 3 : index
    %57 = vector.load %arg3[%c0_23, %c3] : memref<64x9xf32, #tpu.memory_space<vmem>>, vector<64x1xf32>
    %58 = vector.broadcast %57 : vector<64x1xf32> to vector<64x256xf32>
    %59 = arith.mulf %56, %58 : vector<64x256xf32>
    %60 = arith.addf %53, %59 : vector<64x256xf32>
    %c0_24 = arith.constant 0 : index
    %c128_25 = arith.constant 128 : index
    %61 = vector.load %arg6[%c0_24, %c128_25] : memref<64x512xf32, #tpu.memory_space<vmem>>, vector<64x256xf32>
    %c0_26 = arith.constant 0 : index
    %c4 = arith.constant 4 : index
    %62 = vector.load %arg3[%c0_26, %c4] : memref<64x9xf32, #tpu.memory_space<vmem>>, vector<64x1xf32>
    %63 = vector.broadcast %62 : vector<64x1xf32> to vector<64x256xf32>
    %64 = arith.mulf %61, %63 : vector<64x256xf32>
    %65 = arith.addf %60, %64 : vector<64x256xf32>
    %c0_27 = arith.constant 0 : index
    %c129 = arith.constant 129 : index
    %66 = vector.load %arg6[%c0_27, %c129] : memref<64x512xf32, #tpu.memory_space<vmem>>, vector<64x256xf32>
    %67 = vector.broadcast %33 : vector<1x256xf32> to vector<64x256xf32>
    %68 = arith.mulf %66, %67 : vector<64x256xf32>
    %c0_28 = arith.constant 0 : index
    %c5 = arith.constant 5 : index
    %69 = vector.load %arg3[%c0_28, %c5] : memref<64x9xf32, #tpu.memory_space<vmem>>, vector<64x1xf32>
    %70 = vector.broadcast %69 : vector<64x1xf32> to vector<64x256xf32>
    %71 = arith.mulf %68, %70 : vector<64x256xf32>
    %72 = arith.addf %65, %71 : vector<64x256xf32>
    %c0_29 = arith.constant 0 : index
    %c143 = arith.constant 143 : index
    %73 = vector.load %arg6[%c0_29, %c143] : memref<64x512xf32, #tpu.memory_space<vmem>>, vector<64x256xf32>
    %74 = vector.broadcast %29 : vector<1x256xf32> to vector<64x256xf32>
    %75 = arith.mulf %73, %74 : vector<64x256xf32>
    %c0_30 = arith.constant 0 : index
    %c6 = arith.constant 6 : index
    %76 = vector.load %arg3[%c0_30, %c6] : memref<64x9xf32, #tpu.memory_space<vmem>>, vector<64x1xf32>
    %77 = vector.broadcast %76 : vector<64x1xf32> to vector<64x256xf32>
    %78 = arith.mulf %75, %77 : vector<64x256xf32>
    %79 = arith.addf %72, %78 : vector<64x256xf32>
    %c0_31 = arith.constant 0 : index
    %c144 = arith.constant 144 : index
    %80 = vector.load %arg6[%c0_31, %c144] : memref<64x512xf32, #tpu.memory_space<vmem>>, vector<64x256xf32>
    %c0_32 = arith.constant 0 : index
    %c7 = arith.constant 7 : index
    %81 = vector.load %arg3[%c0_32, %c7] : memref<64x9xf32, #tpu.memory_space<vmem>>, vector<64x1xf32>
    %82 = vector.broadcast %81 : vector<64x1xf32> to vector<64x256xf32>
    %83 = arith.mulf %80, %82 : vector<64x256xf32>
    %84 = arith.addf %79, %83 : vector<64x256xf32>
    %c0_33 = arith.constant 0 : index
    %c145 = arith.constant 145 : index
    %85 = vector.load %arg6[%c0_33, %c145] : memref<64x512xf32, #tpu.memory_space<vmem>>, vector<64x256xf32>
    %86 = vector.broadcast %33 : vector<1x256xf32> to vector<64x256xf32>
    %87 = arith.mulf %85, %86 : vector<64x256xf32>
    %c0_34 = arith.constant 0 : index
    %c8 = arith.constant 8 : index
    %88 = vector.load %arg3[%c0_34, %c8] : memref<64x9xf32, #tpu.memory_space<vmem>>, vector<64x1xf32>
    %89 = vector.broadcast %88 : vector<64x1xf32> to vector<64x256xf32>
    %90 = arith.mulf %87, %89 : vector<64x256xf32>
    %91 = arith.addf %84, %90 : vector<64x256xf32>
    %92 = vector.extract_strided_slice %91 {offsets = [0, 0], sizes = [32, 256], strides = [1, 1]} : vector<64x256xf32> to vector<32x256xf32>
    %93 = vector.extract_strided_slice %91 {offsets = [32, 0], sizes = [32, 256], strides = [1, 1]} : vector<64x256xf32> to vector<32x256xf32>
    %cst_35 = arith.constant 5.000000e-01 : f32
    %94 = vector.broadcast %cst_35 : f32 to vector<32x256xf32>
    %95 = arith.mulf %94, %92 : vector<32x256xf32>
    %cst_36 = arith.constant 4.471500e-02 : f32
    %96 = vector.broadcast %cst_36 : f32 to vector<32x256xf32>
    %97 = arith.mulf %96, %92 : vector<32x256xf32>
    %98 = arith.mulf %97, %92 : vector<32x256xf32>
    %99 = arith.mulf %98, %92 : vector<32x256xf32>
    %100 = arith.addf %92, %99 : vector<32x256xf32>
    %cst_37 = arith.constant 0.797884583 : f32
    %101 = vector.broadcast %cst_37 : f32 to vector<32x256xf32>
    %102 = arith.mulf %101, %100 : vector<32x256xf32>
    %103 = math.tanh %102 : vector<32x256xf32>
    %cst_38 = arith.constant 1.000000e+00 : f32
    %104 = vector.broadcast %cst_38 : f32 to vector<32x256xf32>
    %105 = arith.addf %104, %103 : vector<32x256xf32>
    %106 = arith.mulf %95, %105 : vector<32x256xf32>
    %107 = arith.mulf %106, %93 : vector<32x256xf32>
    %c0_39 = arith.constant 0 : index
    %c0_40 = arith.constant 0 : index
    %108 = vector.load %arg4[%c0_39, %c0_40] : memref<32x32xf32, #tpu.memory_space<vmem>>, vector<32x32xf32>
    %cst_41 = arith.constant dense<0.000000e+00> : vector<32x256xf32>
    %109 = tpu.matmul %108, %107, %cst_41 {dimension_numbers = #tpu.dot_dimension_numbers<[1], [0], [0], [1], [0, 0, 1, 1], [], []>} : vector<32x32xf32>, vector<32x256xf32>, vector<32x256xf32> -> vector<32x256xf32>
    %c0_42 = arith.constant 0 : index
    %c0_43 = arith.constant 0 : index
    %c0_44 = arith.constant 0 : index
    %110 = vector.load %arg5[%c0_42, %c0_43, %c0_44] : memref<1x32x256xf32, #tpu.memory_space<vmem>>, vector<1x32x256xf32>
    %111 = vector.shape_cast %110 : vector<1x32x256xf32> to vector<32x256xf32>
    %112 = vector.shape_cast %109 : vector<32x256xf32> to vector<1x32x256xf32>
    tpu.vector_store %arg5[%c0_42, %c0_43, %c0_44], %112 {strides = array<i32>} : memref<1x32x256xf32, #tpu.memory_space<vmem>>, vector<1x32x256xf32>,
    return
  }
  func.func @transform_0(%arg0: i32) -> (i32, i32, i32) {
    %c0_i32 = arith.constant 0 : i32
    %c0_i32_0 = arith.constant 0 : i32
    %c0_i32_1 = arith.constant 0 : i32
    return %arg0, %c0_i32, %c0_i32_0 : i32, i32, i32
  }
  func.func @transform_1(%arg0: i32) -> (i32, i32) {
    %c0_i32 = arith.constant 0 : i32
    %c0_i32_0 = arith.constant 0 : i32
    %c0_i32_1 = arith.constant 0 : i32
    return %c0_i32, %c0_i32_0 : i32, i32
  }
  func.func @transform_2(%arg0: i32) -> (i32, i32) {
    %c0_i32 = arith.constant 0 : i32
    %c0_i32_0 = arith.constant 0 : i32
    %c0_i32_1 = arith.constant 0 : i32
    return %c0_i32, %c0_i32_0 : i32, i32
  }
  func.func @transform_3(%arg0: i32) -> (i32, i32) {
    %c0_i32 = arith.constant 0 : i32
    %c0_i32_0 = arith.constant 0 : i32
    %c0_i32_1 = arith.constant 0 : i32
    return %c0_i32, %c0_i32_0 : i32, i32
  }
  func.func @transform_4(%arg0: i32) -> (i32, i32, i32) {
    %c0_i32 = arith.constant 0 : i32
    %c0_i32_0 = arith.constant 0 : i32
    %c0_i32_1 = arith.constant 0 : i32
    return %arg0, %c0_i32, %c0_i32_0 : i32, i32, i32
  }
}

</mosaic_0001>

<bundles_post_ra>
// kernel: tpu_custom_call.1
= control target key start
LH: loop header
LB: loop body
LE: loop exit
PB: predicated region body
PF: predicated region fallthrough
CT: control target
= control target key end

     0   :  { %9 = vsyncpa [#allocation4], 0  ;;  %s4662_s0 = inlined_call_operand.vmem [shape: f32[2,32,256], index: 0, kind: input, shape index: {}]   ;;  %s4663_s1 = inlined_call_operand.vmem [shape: f32[64,32], index: 1, kind: input, shape index: {}]   ;;  %s4664_s2 = inlined_call_operand.vmem [shape: f32[64,9], index: 2, kind: input, shape index: {}]   ;;  %s4665_s3 = inlined_call_operand.vmem [shape: f32[32,32], index: 3, kind: input, shape index: {}]   ;;  %s4666_s4 = inlined_call_operand.hbm [shape: f32[2,32,256], index: 4, kind: output, shape index: {}]  }
   0x1   :  { %11 = vsyncpa [#allocation4 + $0x1], 0  ;;  %s2917_s15 = smov 0   ;;  %s2919_s16 = smov 0  }
   0x2   :  { %s2921_s17 = smov 0   ;;  %s2923_s18 = smov 0  }
   0x3 LB: > { %s2938_s19 = sadd.s32 4294967295, %s2866_s18   ;;  %s2570_s20 = sadd.s32 4294967294, %s2866_s18   ;;  %s2866_s18 = sphi %s2923_s18, %s4950_s18   ;;  %s2862_s17 = sphi %s2921_s17, %s4949_s17   ;;  %s2858_s16 = sphi %s2919_s16, %s4948_s16   ;;  %s2854_s15 = sphi %s2917_s15, %s4947_s15  }
   0x4   : > { %s2942_s21 = sadd.s32 1, %s2866_s18   ;;  %s113_s22 = sadd.s32 1, %s2862_s17 }
   0x5   : > { %s110_s23 = ssub.s32 %s2866_s18, %s2942_s21  ;;  %p123_p0 = scmp.ne.s32.totalorder %s2862_s17, %s2858_s16 }
   0x6   : > { %p111_p1 = scmp.eq.s32.totalorder %s110_s23, 0  ;;  %p124_p2 = scmp.eq.s32.totalorder %s2938_s19, 1 }
   0x7   : > { %p129_p3 = scmp.ne.s32.totalorder %s2858_s16, %s2854_s15  ;;  %p130_p4 = scmp.eq.s32.totalorder %s2570_s20, 1 }
   0x8   : > { %s2953_s24 = scalar_select %p111_p1, %s2862_s17, %s113_s22  }
   0x9   : > { %p2955_p5 = por %p124_p2, %p123_p0  ;;  %p2959_p6 = por %p130_p4, %p129_p3 }
   0xa   : > { %p2573_p7 = scmp.ge.s32.totalorder %s2866_s18, 1  ;;  %p165_p8 = scmp.lt.s32.totalorder %s2866_s18, 3 }
   0xc   : > { %p166_p9 = pnand %p2573_p7, %p165_p8 }
   0xe   : > { %169 = sbr.rel (%p166_p9) target bundleno = 1782 (0x6f6), region = 36 }
  0x13   : > { %v2968_v0 = vld [vmem:[%s4664_s2 + $0x8] sm:$0xff]  ;;  %p191_p10 = scmp.lt.s32.totalorder %s2938_s19, 1  ;;  %v351_v1 = vlaneseq  ;;  %v2868_v2 = vmov 0   ;;  %v2974_v3 = vld [vmem:[%s4664_s2 + $0x18] sm:$0xff]  ;;  %v2869_v12 = vmov 0.0   ;;  %v2995_v14 = vld [vmem:[%s4664_s2 + $0x10] sm:$0xff] }
  0x14   : > { %2689 = vset.pattern.permute.xlu1 %v2868_v2  ;;  %2690 = vset.pattern.permute.xlu2 %v2868_v2  ;;  %s2870_s12 = smov 111   ;;  %v204_v21 = vld [vmem:[%s4663_s1] sm:$0xff]  ;;  %vm212_vm2 = vcmask 261120   ;;  %v210_v22 = vld [vmem:[%s4663_s1 + $0x30] sm:$0xff]  ;;  %v3021_v24 = vld [vmem:[%s4664_s2 + $0x28] sm:$0xff]  ;;  %v2871_v30 = vmov 1  }
  0x15   : > { %464 = vperm.xlu1 %2689, %v2968_v0   ;;  %s192_s5 = scalar_select %p191_p10, %s2938_s19, 1  ;;  %v2978_v4 = vand.u32 127, %v351_v1  ;;  %474 = vperm.xlu2 %2690, %v2974_v3   ;;  %v3014_v23 = vld [vmem:[%s4664_s2 + $0x20] sm:$0xff]  ;;  %v205_v26 = vld [vmem:[%s4663_s1 + $0x8] sm:$0xff]  ;;  %v211_v27 = vld [vmem:[%s4663_s1 + $0x38] sm:$0xff]  ;;  %v2873_v38 = vmov 2  }
  0x16   : > { %2688 = vset.pattern.permute.xlu0 %v2868_v2  ;;  %v3028_v25 = vld [vmem:[%s4664_s2] sm:$0xff]  ;;  %v3042_v28 = vld [vmem:[%s4664_s2 + $0x30] sm:$0xff]  ;;  %v3051_v29 = vld [vmem:[%s4664_s2 + $0x38] sm:$0xff]  ;;  %s2872_s30 = smov 113   ;;  %s2874_s7 = smov 127   ;;  %vm744_vm5 = vcmask 924672  }
  0x17   : > { %s2610_s6 = sshll.u32 %s192_s5, 6  ;;  %v2982_v5 = vadd.s32 128, %v2978_v4  ;;  %v358_v6 = vand.u32 15, %v2978_v4  ;;  %v206_v31 = vld [vmem:[%s4663_s1 + $0x10] sm:$0xff]  ;;  %v207_v32 = vld [vmem:[%s4663_s1 + $0x18] sm:$0xff]  ;;  %v208_v33 = vld [vmem:[%s4663_s1 + $0x20] sm:$0xff] }
  0x18   : > { %s195_s9 = scalar_lea.vmem %s4662_s0, %s2610_s6  ;;  %v209_v37 = vld [vmem:[%s4663_s1 + $0x28] sm:$0xff]  ;;  %s2875_s8 = smov 126   ;;  %vm673_vm6 = vcmask 1039360   ;;  %vm420_vm7 = vcmask 908288   ;;  %vm1371_vm8 = vcmask 7168   ;;  %vm901_vm9 = vcmask 1031168  }
  0x19   : > { %v202_v7 = vld [vmem:[%s195_s9 + $0x30] sm:$0xff]  ;;  %v203_v8 = vld [vmem:[%s195_s9 + $0x38] sm:$0xff]  ;;  %v200_v9 = vld [vmem:[%s195_s9 + $0x20] sm:$0xff]  ;;  %v365_v10 = vand.u32 15, %v2982_v5  ;;  %vm378_vm0 = vcmp.ge.s32.totalorder %v358_v6, 1  ;;  %vm384_vm3 = vcmp.le.s32.totalorder %v358_v6, 14 }
  0x1a   : > { %249 = vmatpush.msra.mxu0 %v202_v7  ;;  %2612 = vmatpush.msra.mxu2 %v202_v7  ;;  %v201_v11 = vld [vmem:[%s195_s9 + $0x28] sm:$0xff]  ;;  %v2593_v13 = vsel %vm378_vm0, 1.0, %v2869_v12  ;;  %v198_v15 = vld [vmem:[%s195_s9 + $0x10] sm:$0xff]  ;;  %v199_v16 = vld [vmem:[%s195_s9 + $0x18] sm:$0xff]  ;;  %v2595_v34 = vsel %vm384_vm3, 1.0, %v2869_v12  ;;  %s2880_s10 = smov 1  }
  0x1b   : > { %290 = vmatpush.msra.mxu1 %v203_v8  ;;  %2616 = vmatpush.msra.mxu3 %v203_v8  ;;  %vm379_vm1 = vcmp.ge.s32.totalorder %v365_v10, 1  ;;  %v196_v19 = vld [vmem:[%s195_s9] sm:$0xff]  ;;  %v197_v20 = vld [vmem:[%s195_s9 + $0x8] sm:$0xff]  ;;  %vm385_vm4 = vcmp.le.s32.totalorder %v365_v10, 14  ;;  %s2877_s9 = smov 112   ;;  %s2883_s14 = smov 15  }
  0x1c   : > { %250 = vmatpush.msra.mxu0 %v200_v9  ;;  %2613 = vmatpush.msra.mxu2 %v200_v9  ;;  %v2594_v17 = vsel %vm379_vm1, 1.0, %v2869_v12  ;;  %v2596_v35 = vsel %vm385_vm4, 1.0, %v2869_v12  ;;  %vm1126_vm10 = vcmask 916480   ;;  %vm1528_vm11 = vcmask 900096   ;;  %s2884_s11 = smov 96   ;;  %s2887_s13 = smov 17  }
  0x1d   : > { %291 = vmatpush.msra.mxu1 %v201_v11  ;;  %2617 = vmatpush.msra.mxu3 %v201_v11  ;;  %v3000_v18 = vpack.i.bf16 %v2594_v17, %v2593_v13  ;;  %v3082_v36 = vpack.i.bf16 %v2596_v35, %v2595_v34  ;;  %vm1597_vm12 = vcmask 121856   ;;  %vm1754_vm13 = vcmask 785408   ;;  %s2889_s20 = smov 94   ;;  %s2824_s29 = scalar_lea.hbm %s4666_s4, 128 }
  0x1e   : > { %469 = vperm.xlu1 %2689, %v2995_v14   ;;  %251 = vmatpush.msra.mxu0 %v198_v15  ;;  %vm2016_vm14 = vcmask 138240   ;;  %vm1947_vm15 = vcmask 777216   ;;  %vm2173_vm0 = vcmask 769024  }
  0x1f   : > { %2614 = vmatpush.msra.mxu2 %v198_v15  ;;  %292 = vmatpush.msra.mxu1 %v199_v16  ;;  %4742 = vst [vmem:[#allocation6_spill] sm:$0xff] %v3082_v36 }
  0x20   : > { %2618 = vmatpush.msra.mxu3 %v199_v16  ;;  %2684 = vrot.lane.b32.xlu0 %v3000_v18, %s2870_s12 }
  0x21   : > { %252 = vmatpush.msra.mxu0 %v196_v19  ;;  %2615 = vmatpush.msra.mxu2 %v196_v19 }
  0x22   : > { %293 = vmatpush.msra.mxu1 %v197_v20  ;;  %2619 = vmatpush.msra.mxu3 %v197_v20 }
  0x23   : > { %2577 = vmatmul.msk.f32.vlgmr.msra.gmra.mxu0 %vm212_vm2, %v204_v21  ;;  %2583 = vmatmul.msk.f32.vlgmr.msra.gmra.mxu2 %vm212_vm2, %v210_v22 }
  0x24   : > { %2585 = vmatmul.msk.f32.vlgmr.msra.gmra.mxu1 %vm212_vm2, %v204_v21  ;;  %2591 = vmatmul.msk.f32.vlgmr.msra.gmra.mxu3 %vm212_vm2, %v210_v22 }
  0x25   : > { %479 = vperm.xlu2 %2690, %v3014_v23  }
  0x26   : > { %484 = vperm.xlu1 %2689, %v3021_v24  }
  0x28   : > { %459 = vperm.xlu0 %2688, %v3028_v25  }
  0x2b   : > { %2578 = vmatmul.msk.f32.gmra.mxu0 %vm212_vm2, %v205_v26  ;;  %2584 = vmatmul.msk.f32.gmra.mxu2 %vm212_vm2, %v211_v27 }
  0x2c   : > { %2586 = vmatmul.msk.f32.gmra.mxu1 %vm212_vm2, %v205_v26  ;;  %2592 = vmatmul.msk.f32.gmra.mxu3 %vm212_vm2, %v211_v27 }
  0x2d   : > { %489 = vperm.xlu2 %2690, %v3042_v28  }
  0x2e   : > { %2691 = vset.pattern.permute.xlu1 %v2871_v30 }
  0x2f   : > { %546 = vperm.xlu1 %2691, %v3028_v25  }
  0x30   : > { %494 = vperm.xlu0 %2688, %v3051_v29  }
  0x33   : > { %2579 = vmatmul.msk.f32.gmra.mxu0 %vm212_vm2, %v206_v31 }
  0x34   : > { %2587 = vmatmul.msk.f32.gmra.mxu1 %vm212_vm2, %v206_v31 }
  0x35   : > { %2692 = vset.pattern.permute.xlu2 %v2871_v30 }
  0x36   : > { %550 = vperm.xlu2 %2692, %v2968_v0  }
  0x37   : > { %558 = vperm.xlu1 %2691, %v2974_v3  }
  0x38   : > { %2693 = vset.pattern.permute.xlu0 %v2871_v30 }
  0x39   : > { %554 = vperm.xlu0 %2693, %v2995_v14  }
  0x3b   : > { %2580 = vmatmul.msk.f32.gmra.mxu0 %vm212_vm2, %v207_v32 }
  0x3c   : > { %2588 = vmatmul.msk.f32.gmra.mxu1 %vm212_vm2, %v207_v32 }
  0x3e   : > { %562 = vperm.xlu2 %2692, %v3014_v23  }
  0x3f   : > { %566 = vperm.xlu1 %2691, %v3021_v24  }
  0x41   : > { %574 = vperm.xlu0 %2693, %v3051_v29  }
  0x43   : > { %2581 = vmatmul.msk.f32.gmra.mxu0 %vm212_vm2, %v208_v33 }
  0x44   : > { %2589 = vmatmul.msk.f32.gmra.mxu1 %vm212_vm2, %v208_v33 }
  0x46   : > { %570 = vperm.xlu2 %2692, %v3042_v28  }
  0x47   : > { %2695 = vrot.lane.b32.xlu1 %v3082_v36, %s2872_s30 }
  0x48   : > { %2701 = vset.pattern.permute.xlu1 %v2873_v38 }
  0x49   : > { %2700 = vset.pattern.permute.xlu0 %v2873_v38 }
  0x4a   : > { %778 = vperm.xlu0 %2700, %v2968_v0  }
  0x4b   : > { %2582 = vmatmul.msk.f32.gmra.mxu0 %vm212_vm2, %v209_v37 }
  0x4c   : > { %2590 = vmatmul.msk.f32.gmra.mxu1 %vm212_vm2, %v209_v37 }
  0x4e   : > { %2699 = vset.pattern.permute.xlu2 %v2873_v38 }
  0x4f   : > { %774 = vperm.xlu2 %2699, %v3028_v25  }
  0x52   : > { %798 = vperm.xlu0 %2700, %v3042_v28  }
  0x57   : > { %786 = vperm.xlu2 %2699, %v2974_v3  }
  0x5f   : > { %794 = vperm.xlu2 %2699, %v3021_v24  }
  0x6f   : > { %v3097_v39 = vpop.permute.xlu2 %474 }
  0x70   : > { %4743 = vst [vmem:[#allocation7_spill] sm:$0xff] %v3097_v39 }
  0x7f   : > { %v3101_v41 = vpop.permute.xlu2 %479 }
  0x80   : > { %4745 = vst [vmem:[#allocation9_spill] sm:$0xff] %v3101_v41 }
  0x87   : > { %v3099_v40 = vpop.permute.xlu1 %464  ;;  %v3107_v44 = vpop.permute.xlu2 %489 }
  0x88   : > { %4744 = vst [vmem:[#allocation8_spill] sm:$0xff] %v3099_v40 }
  0x89   : > { %4747 = vst [vmem:[#allocation11_spill] sm:$0xff] %v3107_v44 }
  0x90   : > { %v3103_v42 = vpop.permute.xlu1 %469  ;;  %v3113_v47 = vpop.permute.xlu2 %550 }
  0x91   : > { %4746 = vst [vmem:[#allocation10_spill] sm:$0xff] %v3103_v42  ;;  %v580_v53 = vmul.f32 0.0, %v3113_v47 }
  0x92   : > { %v3105_v43 = vpop.permute.xlu0 %2684 }
  0x98   : > { %v3109_v45 = vpop.permute.xlu1 %484  ;;  %v3129_v55 = vpop.permute.xlu2 %562 }
  0x99   : > { %v589_v7 = vmul.f32 0.0, %v3129_v55 }
  0x9a   : > { %v3111_v46 = vpop.permute.xlu0 %459 }
  0xa0   : > { %v3137_v59 = vpop.permute.xlu2 %570  ;;  %v3143_v1 = vpop.f32.mrf.mxu0 }
  0xa1   : > { %v3115_v48 = vpop.f32.mrf.mxu1  ;;  %v3117_v49 = vpop.permute.xlu1 %546  ;;  %v595_v17 = vmul.f32 0.0, %v3137_v59 }
  0xa2   : > { %4748 = vst [vmem:[#allocation12_spill] sm:$0xff] %v3115_v48  ;;  %v577_v50 = vmul.f32 0.0, %v3117_v49  ;;  %v579_v51 = vmul.f32 %v3117_v49, %v3115_v48  ;;  %v3124_v52 = vpop.permute.xlu0 %494 }
  0xa3   : > { %4749 = vst [vmem:[#allocation13_spill] sm:$0xff] %v3124_v52 }
  0xa4   : > { %625 = vrot.lane.b32.xlu1 %v577_v50, %s2874_s7  ;;  %629 = vrot.lane.b32.xlu0 %v579_v51, %s2874_s7 }
  0xa7   : > { %v3154_v8 = vpop.f32.mrf.mxu3 }
  0xa8   : > { %v597_v9 = vmul.f32 %v3137_v59, %v3154_v8  ;;  %v3167_v15 = vpop.f32.mrf.mxu0 }
  0xa9   : > { %v3127_v54 = vpop.permute.xlu1 %558  ;;  %v775_v4 = vpop.permute.xlu2 %774 }
  0xaa   : > { %v586_v63 = vmul.f32 0.0, %v3127_v54  ;;  %v3163_v12 = vpop.f32.mrf.mxu1 }
  0xab   : > { %v3132_v56 = vpop.permute.xlu0 %554  ;;  %v582_v13 = vmul.f32 %v3113_v47, %v3163_v12 }
  0xac   : > { %631 = vrot.lane.b32.xlu1 %v580_v53, %s2874_s7  ;;  %v583_v57 = vmul.f32 0.0, %v3132_v56 }
  0xaf   : > { %v3177_v22 = vpop.f32.mrf.mxu3 }
  0xb1   : > { %v3135_v58 = vpop.permute.xlu1 %566 }
  0xb2   : > { %v592_v11 = vmul.f32 0.0, %v3135_v58  ;;  %v3186_v31 = vpop.f32.mrf.mxu1 }
  0xb3   : > { %v3159_v10 = vpop.permute.xlu0 %574  ;;  %v585_v32 = vmul.f32 %v3132_v56, %v3186_v31 }
  0xb4   : > { %637 = vrot.lane.b32.xlu1 %v583_v57, %s2874_s7  ;;  %v598_v21 = vmul.f32 0.0, %v3159_v10  ;;  %v600_v26 = vmul.f32 %v3159_v10, %v3177_v22 }
  0xb9   : > { %v2696_v60 = vpop.permute.xlu1 %2695 }
  0xba   : > { %v3140_v61 = vunpack.i.h.bf16 %v2696_v60  ;;  %v2697_v62 = vunpack.i.l.bf16 %v2696_v60 }
  0xbc   : > { %v3146_v2 = vsel %vm744_vm5, %v2697_v62, %v3140_v61  ;;  %643 = vrot.lane.b32.xlu1 %v586_v63, %s2874_s7  ;;  %v779_v19 = vpop.permute.xlu0 %778  ;;  %v3181_v27 = vmul.f32 0.0, %v2697_v62  ;;  %v751_v34 = vmul.f32 %v3140_v61, %v3115_v48  ;;  %v754_v37 = vmul.f32 %v3140_v61, %v3163_v12 }
  0xbd   : > { %v750_v5 = vmul.f32 %v3146_v2, %v3143_v1  ;;  %v753_v16 = vmul.f32 %v3146_v2, %v3167_v15 }
  0xbe   : > { %v805_v30 = vmul.f32 %v775_v4, %v3181_v27  ;;  %v808_v33 = vmul.f32 %v779_v19, %v3181_v27  ;;  %v807_v35 = vmul.f32 %v775_v4, %v751_v34  ;;  %v810_v38 = vmul.f32 %v779_v19, %v754_v37 }
  0xbf   : > { %v806_v6 = vmul.f32 %v775_v4, %v750_v5  ;;  %v809_v20 = vmul.f32 %v779_v19, %v753_v16  ;;  %v3218_v5 = vpop.f32.mrf.mxu0 }
  0xc0   : > { %853 = vrot.lane.b32.xlu2 %v805_v30, %s2875_s8 }
  0xc1   : > { %855 = vrot.lane.b32.xlu0 %v806_v6, %s2875_s8  ;;  %v757_v6 = vmul.f32 %v3140_v61, %v3186_v31 }
  0xc4   : > { %649 = vrot.lane.b32.xlu1 %v589_v7, %s2874_s7  ;;  %v756_v7 = vmul.f32 %v3146_v2, %v3218_v5 }
  0xc8   : > { %859 = vrot.lane.b32.xlu2 %v808_v33, %s2875_s8  ;;  %v3240_v33 = vpop.f32.mrf.mxu0 }
  0xc9   : > { %665 = vrot.lane.b32.xlu0 %v597_v9, %s2874_s7  ;;  %v3224_v9 = vpop.f32.mrf.mxu1 }
  0xca   : > { %v760_v19 = vmul.f32 %v3140_v61, %v3224_v9 }
  0xcc   : > { %655 = vrot.lane.b32.xlu1 %v592_v11, %s2874_s7 }
  0xd1   : > { %635 = vrot.lane.b32.xlu0 %v582_v13, %s2874_s7  ;;  %v3233_v30 = vpop.f32.mrf.mxu1 }
  0xd2   : > { %v763_v37 = vmul.f32 %v3140_v61, %v3233_v30 }
  0xd4   : > { %661 = vrot.lane.b32.xlu1 %v595_v17, %s2874_s7 }
  0xd9   : > { %861 = vrot.lane.b32.xlu0 %v809_v20, %s2875_s8  ;;  %v787_v20 = vpop.permute.xlu2 %786 }
  0xdc   : > { %667 = vrot.lane.b32.xlu1 %v598_v21, %s2874_s7  ;;  %v814_v21 = vmul.f32 %v787_v20, %v3181_v27 }
  0xe1   : > { %671 = vrot.lane.b32.xlu0 %v600_v26, %s2874_s7  ;;  %v816_v26 = vmul.f32 %v787_v20, %v760_v19 }
  0xe4   : > { %782 = vperm.xlu1 %2701, %v2995_v14  }
  0xe9   : > { %641 = vrot.lane.b32.xlu0 %v585_v32, %s2874_s7  ;;  %v588_v32 = vmul.f32 %v3127_v54, %v3224_v9 }
  0xec   : > { %790 = vperm.xlu1 %2701, %v3014_v23  }
  0xf4   : > { %802 = vperm.xlu1 %2701, %v3051_v29  }
  0xfc   : > { %857 = vrot.lane.b32.xlu1 %v807_v35, %s2875_s8  ;;  %v759_v35 = vmul.f32 %v3146_v2, %v3240_v33 }
 0x104   : > { %863 = vrot.lane.b32.xlu1 %v810_v38, %s2875_s8 }
 0x116   : > { %v3202_v50 = vpop.permute.xlu1 %625 }
 0x11e   : > { %v3204_v51 = vpop.permute.xlu1 %631 }
 0x11f   : > { %4750 = vst [vmem:[#allocation14_spill] sm:$0xff] %v3204_v51 }
 0x126   : > { %v3206_v53 = vpop.permute.xlu1 %637 }
 0x127   : > { %4751 = vst [vmem:[#allocation15_spill] sm:$0xff] %v3206_v53 }
 0x12e   : > { %v3208_v57 = vpop.permute.xlu1 %643 }
 0x136   : > { %v3210_v60 = vpop.permute.xlu1 %649 }
 0x137   : > { %4752 = vst [vmem:[#allocation16_spill] sm:$0xff] %v3210_v60 }
 0x13e   : > { %v3212_v62 = vpop.permute.xlu1 %655 }
 0x146   : > { %v3214_v63 = vpop.permute.xlu1 %661 }
 0x147   : > { %4753 = vst [vmem:[#allocation17_spill] sm:$0xff] %v3214_v63 }
 0x14e   : > { %v3216_v4 = vpop.permute.xlu1 %667 }
 0x14f   : > { %4754 = vst [vmem:[#allocation18_spill] sm:$0xff] %v3216_v4 }
 0x156   : > { %v783_v11 = vpop.permute.xlu1 %782 }
 0x157   : > { %v811_v13 = vmul.f32 %v783_v11, %v3181_v27  ;;  %v813_v16 = vmul.f32 %v783_v11, %v757_v6  ;;  %v812_v17 = vmul.f32 %v783_v11, %v756_v7  ;;  %v815_v7 = vmul.f32 %v787_v20, %v759_v35  ;;  %v3249_v11 = vpop.f32.mrf.mxu1 }
 0x158   : > { %4755 = vst [vmem:[#allocation19_spill] sm:$0xff] %v3249_v11  ;;  %v769_v20 = vmul.f32 %v3140_v61, %v3154_v8 }
 0x159   : > { %865 = vrot.lane.b32.xlu2 %v811_v13, %s2875_s8  ;;  %869 = vrot.lane.b32.xlu1 %v813_v16, %s2875_s8  ;;  %v766_v13 = vmul.f32 %v3140_v61, %v3249_v11  ;;  %v795_v16 = vpop.permute.xlu2 %794 }
 0x15a   : > { %867 = vrot.lane.b32.xlu0 %v812_v17, %s2875_s8  ;;  %v820_v17 = vmul.f32 %v795_v16, %v3181_v27 }
 0x15b   : > { %v822_v19 = vmul.f32 %v795_v16, %v766_v13  ;;  %v772_v13 = vmul.f32 %v3140_v61, %v3177_v22 }
 0x15e   : > { %v791_v34 = vpop.permute.xlu1 %790 }
 0x15f   : > { %v817_v38 = vmul.f32 %v791_v34, %v3181_v27  ;;  %v819_v6 = vmul.f32 %v791_v34, %v763_v37 }
 0x161   : > { %871 = vrot.lane.b32.xlu2 %v814_v21, %s2875_s8  ;;  %875 = vrot.lane.b32.xlu1 %v816_v26, %s2875_s8  ;;  %v591_v21 = vmul.f32 %v3129_v55, %v3233_v30  ;;  %v3262_v26 = vpop.f32.mrf.mxu0 }
 0x162   : > { %647 = vrot.lane.b32.xlu0 %v588_v32, %s2874_s7  ;;  %v799_v32 = vpop.permute.xlu0 %798  ;;  %v762_v35 = vmul.f32 %v3146_v2, %v3262_v26 }
 0x163   : > { %v825_v37 = vmul.f32 %v799_v32, %v769_v20 }
 0x169   : > { %877 = vrot.lane.b32.xlu2 %v817_v38, %s2875_s8  ;;  %881 = vrot.lane.b32.xlu1 %v819_v6, %s2875_s8  ;;  %v578_v38 = vmul.f32 %v3117_v49, %v3143_v1  ;;  %v818_v6 = vmul.f32 %v791_v34, %v762_v35  ;;  %v594_v49 = vmul.f32 %v3135_v58, %v3249_v11  ;;  %v2876_v34 = vmov 3   ;;  %v3282_v20 = vpop.f32.mrf.mxu0 }
 0x16a   : > { %873 = vrot.lane.b32.xlu0 %v815_v7, %s2875_s8  ;;  %v803_v7 = vpop.permute.xlu1 %802  ;;  %2708 = vset.pattern.permute.xlu1 %v2876_v34  ;;  %4756 = vst [vmem:[#allocation20_spill] sm:$0xff] %v3282_v20  ;;  %v765_v61 = vmul.f32 %v3146_v2, %v3282_v20 }
 0x16b   : > { %2707 = vset.pattern.permute.xlu0 %v2876_v34  ;;  %2709 = vset.pattern.permute.xlu2 %v2876_v34  ;;  %v587_v34 = vmul.f32 %v3127_v54, %v3240_v33  ;;  %v593_v54 = vmul.f32 %v3135_v58, %v3282_v20 }
 0x16c   : > { %v821_v35 = vmul.f32 %v795_v16, %v765_v61  ;;  %v3315_v61 = vpop.permute.xlu2 %853 }
 0x171   : > { %883 = vrot.lane.b32.xlu2 %v820_v17, %s2875_s8  ;;  %887 = vrot.lane.b32.xlu1 %v822_v19, %s2875_s8  ;;  %v3273_v17 = vpop.f32.mrf.mxu2  ;;  %v828_v19 = vmul.f32 %v803_v7, %v772_v13 }
 0x172   : > { %653 = vrot.lane.b32.xlu0 %v591_v21, %s2874_s7  ;;  %v596_v21 = vmul.f32 %v3137_v59, %v3273_v17  ;;  %v581_v59 = vmul.f32 %v3113_v47, %v3167_v15 }
 0x179   : > { %893 = vrot.lane.b32.xlu1 %v825_v37, %s2875_s8  ;;  %627 = vrot.lane.b32.xlu2 %v578_v38, %s2874_s7  ;;  %v768_v37 = vmul.f32 %v3146_v2, %v3273_v17  ;;  %v3293_v38 = vpop.permute.xlu0 %629 }
 0x17a   : > { %879 = vrot.lane.b32.xlu0 %v818_v6, %s2875_s8  ;;  %4757 = vst [vmem:[#allocation21_spill] sm:$0xff] %v3293_v38  ;;  %v3295_v6 = vpop.f32.mrf.mxu2 }
 0x17b   : > { %v599_v13 = vmul.f32 %v3159_v10, %v3295_v6  ;;  %v771_v16 = vmul.f32 %v3146_v2, %v3295_v6 }
 0x181   : > { %899 = vrot.lane.b32.xlu1 %v828_v19, %s2875_s8  ;;  %663 = vrot.lane.b32.xlu2 %v596_v21, %s2874_s7  ;;  %v824_v19 = vmul.f32 %v799_v32, %v768_v37  ;;  %v3302_v47 = vpop.permute.xlu0 %855  ;;  %v584_v21 = vmul.f32 %v3132_v56, %v3218_v5  ;;  %v590_v56 = vmul.f32 %v3129_v55, %v3262_v26 }
 0x182   : > { %659 = vrot.lane.b32.xlu0 %v594_v49, %s2874_s7  ;;  %v827_v49 = vmul.f32 %v803_v7, %v771_v16  ;;  %v826_v16 = vmul.f32 %v803_v7, %v3181_v27  ;;  %v3361_v7 = vpop.permute.xlu1 %857 }
 0x189   : > { %633 = vrot.lane.b32.xlu2 %v581_v59, %s2874_s7  ;;  %1003 = vperm.xlu1 %2708, %v2968_v0   ;;  %v3311_v10 = vpop.permute.xlu0 %665  ;;  %v3325_v59 = vpop.permute.xlu2 %859 }
 0x18a   : > { %885 = vrot.lane.b32.xlu0 %v821_v35, %s2875_s8  ;;  %4758 = vst [vmem:[#allocation22_spill] sm:$0xff] %v3311_v10 }
 0x18b   : > { %4759 = vst [vmem:[#allocation23_spill] sm:$0xff] %v3325_v59 }
 0x191   : > { %669 = vrot.lane.b32.xlu2 %v599_v13, %s2874_s7  ;;  %1011 = vperm.xlu1 %2708, %v2974_v3   ;;  %v3321_v2 = vpop.permute.xlu0 %635  ;;  %v823_v13 = vmul.f32 %v799_v32, %v3181_v27 }
 0x192   : > { %891 = vrot.lane.b32.xlu0 %v824_v19, %s2875_s8 }
 0x199   : > { %639 = vrot.lane.b32.xlu2 %v584_v21, %s2874_s7  ;;  %1023 = vperm.xlu1 %2708, %v3042_v28   ;;  %v3330_v35 = vpop.permute.xlu0 %861 }
 0x19a   : > { %897 = vrot.lane.b32.xlu0 %v827_v49, %s2875_s8  ;;  %4760 = vst [vmem:[#allocation24_spill] sm:$0xff] %v3330_v35 }
 0x1a1   : > { %645 = vrot.lane.b32.xlu2 %v587_v34, %s2874_s7  ;;  %v3338_v19 = vpop.permute.xlu0 %671 }
 0x1a2   : > { %999 = vperm.xlu0 %2707, %v3028_v25   ;;  %4762 = vst [vmem:[#allocation26_spill] sm:$0xff] %v3338_v19 }
 0x1a9   : > { %651 = vrot.lane.b32.xlu2 %v590_v56, %s2874_s7  ;;  %v3344_v58 = vpop.permute.xlu0 %641 }
 0x1aa   : > { %1019 = vperm.xlu0 %2707, %v3021_v24   ;;  %4764 = vst [vmem:[#allocation28_spill] sm:$0xff] %v3344_v58 }
 0x1b1   : > { %657 = vrot.lane.b32.xlu2 %v593_v54, %s2874_s7 }
 0x1b3   : > { %v3332_v37 = vpop.permute.xlu2 %865 }
 0x1b4   : > { %4761 = vst [vmem:[#allocation25_spill] sm:$0xff] %v3332_v37 }
 0x1b9   : > { %889 = vrot.lane.b32.xlu2 %v823_v13, %s2875_s8 }
 0x1bb   : > { %v3336_v55 = vpop.permute.xlu2 %871 }
 0x1c1   : > { %895 = vrot.lane.b32.xlu2 %v826_v16, %s2875_s8 }
 0x1c3   : > { %v3342_v21 = vpop.permute.xlu2 %877 }
 0x1c4   : > { %4763 = vst [vmem:[#allocation27_spill] sm:$0xff] %v3342_v21  ;;  %v3369_v21 = vpop.permute.xlu1 %863 }
 0x1c9   : > { %2703 = vrot.lane.b32.xlu2 %v3000_v18, %s2874_s7  ;;  %s188_s7 = sand.u32 1, %s2858_s16  }
 0x1ca   : > { %s2574_s8 = sshll.u32 %s188_s7, 6  ;;  %s2493_s22 = scalar_lea.sflag [#allocation4], %s188_s7 }
 0x1cb   : > { %v3348_v49 = vpop.permute.xlu2 %883 }
 0x1cc   : > { %4765 = vst [vmem:[#allocation29_spill] sm:$0xff] %v3348_v49  ;;  %v3350_v32 = vpop.permute.xlu0 %867 }
 0x1cd   : > { %4766 = vst [vmem:[#allocation30_spill] sm:$0xff] %v3350_v32  ;;  %v3375_v32 = vpop.permute.xlu1 %869 }
 0x1ce   : > { %4773 = vst [vmem:[#allocation37_spill] sm:$0xff] %v3375_v32 }
 0x1d1   : > { %1007 = vperm.xlu2 %2709, %v2995_v14  }
 0x1d3   : > { %v3353_v34 = vpop.permute.xlu2 %627 }
 0x1d4   : > { %v3355_v56 = vpop.permute.xlu0 %647 }
 0x1d5   : > { %4767 = vst [vmem:[#allocation31_spill] sm:$0xff] %v3355_v56  ;;  %v3381_v53 = vpop.permute.xlu1 %875 }
 0x1d6   : > { %4775 = vst [vmem:[#allocation39_spill] sm:$0xff] %v3381_v53 }
 0x1d9   : > { %1015 = vperm.xlu2 %2709, %v3014_v23  }
 0x1db   : > { %v3358_v27 = vpop.permute.xlu2 %663 }
 0x1dc   : > { %4768 = vst [vmem:[#allocation32_spill] sm:$0xff] %v3358_v27  ;;  %v3363_v54 = vpop.permute.xlu0 %873 }
 0x1dd   : > { %v3387_v19 = vpop.permute.xlu1 %881 }
 0x1de   : > { %4778 = vst [vmem:[#allocation42_spill] sm:$0xff] %v3387_v19 }
 0x1e1   : > { %1027 = vperm.xlu2 %2709, %v3051_v29  }
 0x1e3   : > { %v3365_v13 = vpop.permute.xlu2 %633 }
 0x1e4   : > { %4769 = vst [vmem:[#allocation33_spill] sm:$0xff] %v3365_v13  ;;  %v3371_v60 = vpop.permute.xlu0 %653 }
 0x1e5   : > { %4771 = vst [vmem:[#allocation35_spill] sm:$0xff] %v3371_v60  ;;  %v3393_v60 = vpop.permute.xlu1 %887 }
 0x1e6   : > { %4780 = vst [vmem:[#allocation44_spill] sm:$0xff] %v3393_v60 }
 0x1eb   : > { %v3367_v16 = vpop.permute.xlu2 %669 }
 0x1ec   : > { %4770 = vst [vmem:[#allocation34_spill] sm:$0xff] %v3367_v16  ;;  %v3377_v58 = vpop.permute.xlu0 %879 }
 0x1ed   : > { %4774 = vst [vmem:[#allocation38_spill] sm:$0xff] %v3377_v58  ;;  %v3401_v52 = vpop.permute.xlu1 %893 }
 0x1ee   : > { %4784 = vst [vmem:[#allocation48_spill] sm:$0xff] %v3401_v52 }
 0x1f3   : > { %v3373_v37 = vpop.permute.xlu2 %639 }
 0x1f4   : > { %4772 = vst [vmem:[#allocation36_spill] sm:$0xff] %v3373_v37  ;;  %v3383_v59 = vpop.permute.xlu0 %659 }
 0x1f5   : > { %4776 = vst [vmem:[#allocation40_spill] sm:$0xff] %v3383_v59 }
 0x1fb   : > { %v3379_v42 = vpop.permute.xlu2 %645 }
 0x1fc   : > { %v3389_v10 = vpop.permute.xlu0 %885 }
 0x1fd   : > { %4779 = vst [vmem:[#allocation43_spill] sm:$0xff] %v3389_v10 }
 0x203   : > { %v3385_v51 = vpop.permute.xlu2 %651 }
 0x204   : > { %4777 = vst [vmem:[#allocation41_spill] sm:$0xff] %v3385_v51  ;;  %v3397_v32 = vpop.permute.xlu0 %891 }
 0x205   : > { %4782 = vst [vmem:[#allocation46_spill] sm:$0xff] %v3397_v32 }
 0x20b   : > { %v3391_v41 = vpop.permute.xlu2 %657 }
 0x20c   : > { %v3403_v4 = vpop.permute.xlu0 %897 }
 0x20d   : > { %4785 = vst [vmem:[#allocation49_spill] sm:$0xff] %v3403_v4 }
 0x213   : > { %v3395_v37 = vpop.permute.xlu2 %889 }
 0x214   : > { %4781 = vst [vmem:[#allocation45_spill] sm:$0xff] %v3395_v37  ;;  %v3415_v37 = vpop.permute.xlu1 %899 }
 0x215   : > { %4786 = vst [vmem:[#allocation50_spill] sm:$0xff] %v3415_v37 }
 0x21b   : > { %v3399_v58 = vpop.permute.xlu2 %895 }
 0x21c   : > { %4783 = vst [vmem:[#allocation47_spill] sm:$0xff] %v3399_v58  ;;  %v1000_v58 = vpop.permute.xlu0 %999  ;;  %v1004_v56 = vpop.permute.xlu1 %1003 }
 0x223   : > { %v2704_v59 = vpop.permute.xlu2 %2703 }
 0x224   : > { %v3405_v51 = vunpack.i.h.bf16 %v2704_v59  ;;  %v2705_v19 = vunpack.i.l.bf16 %v2704_v59 }
 0x226   : > { %v3409_v16 = vsel %vm673_vm6, %v2705_v19, %v3405_v51  ;;  %v3411_v60 = vmul.f32 0.0, %v2705_v19  ;;  %v976_v53 = vmul.f32 %v3405_v51, %v3115_v48  ;;  %v979_v19 = vmul.f32 %v3405_v51, %v3163_v12 }
 0x227   : > { %v975_v52 = vmul.f32 %v3409_v16, %v3143_v1  ;;  %v978_v37 = vmul.f32 %v3409_v16, %v3167_v15 }
 0x228   : > { %v1032_v4 = vmul.f32 %v1000_v58, %v976_v53  ;;  %v1030_v32 = vmul.f32 %v1000_v58, %v3411_v60  ;;  %v1035_v44 = vmul.f32 %v1004_v56, %v979_v19  ;;  %v1033_v53 = vmul.f32 %v1004_v56, %v3411_v60 }
 0x229   : > { %v1031_v59 = vmul.f32 %v1000_v58, %v975_v52  ;;  %v1034_v63 = vmul.f32 %v1004_v56, %v978_v37  ;;  %v981_v58 = vmul.f32 %v3409_v16, %v3218_v5  ;;  %v1012_v37 = vpop.permute.xlu1 %1011 }
 0x22a   : > { %1082 = vrot.lane.b32.xlu2 %v1032_v4, %s2877_s9  ;;  %1078 = vrot.lane.b32.xlu0 %v1030_v32, %s2877_s9  ;;  %v982_v4 = vmul.f32 %v3405_v51, %v3186_v31 }
 0x22b   : > { %1080 = vrot.lane.b32.xlu1 %v1031_v59, %s2877_s9  ;;  %v1008_v52 = vpop.permute.xlu2 %1007 }
 0x22c   : > { %v1038_v32 = vmul.f32 %v1008_v52, %v982_v4  ;;  %v1036_v59 = vmul.f32 %v1008_v52, %v3411_v60  ;;  %v1037_v19 = vmul.f32 %v1008_v52, %v981_v58  ;;  %v2878_v52 = vmov 4  }
 0x22d   : > { %2710 = vset.pattern.permute.xlu0 %v2878_v52  ;;  %2712 = vset.pattern.permute.xlu2 %v2878_v52 }
 0x22e   : > { %2711 = vset.pattern.permute.xlu1 %v2878_v52 }
 0x232   : > { %1088 = vrot.lane.b32.xlu2 %v1035_v44, %s2877_s9  ;;  %1084 = vrot.lane.b32.xlu0 %v1033_v53, %s2877_s9  ;;  %v985_v44 = vmul.f32 %v3405_v51, %v3224_v9  ;;  %v1039_v53 = vmul.f32 %v1012_v37, %v3411_v60 }
 0x233   : > { %1086 = vrot.lane.b32.xlu1 %v1034_v63, %s2877_s9  ;;  %v984_v63 = vmul.f32 %v3409_v16, %v3240_v33  ;;  %v1016_v58 = vpop.permute.xlu2 %1015 }
 0x234   : > { %v1041_v56 = vmul.f32 %v1012_v37, %v985_v44  ;;  %v1042_v44 = vmul.f32 %v1016_v58, %v3411_v60 }
 0x235   : > { %v1040_v4 = vmul.f32 %v1012_v37, %v984_v63  ;;  %v991_v37 = vmul.f32 %v3405_v51, %v3249_v11 }
 0x23a   : > { %1094 = vrot.lane.b32.xlu2 %v1038_v32, %s2877_s9  ;;  %1090 = vrot.lane.b32.xlu0 %v1036_v59, %s2877_s9  ;;  %v988_v32 = vmul.f32 %v3405_v51, %v3233_v30  ;;  %v987_v59 = vmul.f32 %v3409_v16, %v3262_v26 }
 0x23b   : > { %1092 = vrot.lane.b32.xlu1 %v1037_v19, %s2877_s9 }
 0x23c   : > { %v1044_v19 = vmul.f32 %v1016_v58, %v988_v32  ;;  %v1043_v63 = vmul.f32 %v1016_v58, %v987_v59  ;;  %v994_v58 = vmul.f32 %v3405_v51, %v3154_v8  ;;  %v1024_v59 = vpop.permute.xlu1 %1023 }
 0x242   : > { %1100 = vrot.lane.b32.xlu2 %v1041_v56, %s2877_s9  ;;  %1096 = vrot.lane.b32.xlu0 %v1039_v53, %s2877_s9  ;;  %v1020_v56 = vpop.permute.xlu0 %1019  ;;  %v990_v53 = vmul.f32 %v3409_v16, %v3282_v20 }
 0x243   : > { %1098 = vrot.lane.b32.xlu1 %v1040_v4, %s2877_s9  ;;  %v1047_v4 = vmul.f32 %v1020_v56, %v991_v37  ;;  %v1045_v52 = vmul.f32 %v1020_v56, %v3411_v60 }
 0x244   : > { %v1046_v32 = vmul.f32 %v1020_v56, %v990_v53  ;;  %v1028_v56 = vpop.permute.xlu2 %1027  ;;  %v997_v53 = vmul.f32 %v3405_v51, %v3177_v22 }
 0x24a   : > { %1106 = vrot.lane.b32.xlu2 %v1044_v19, %s2877_s9  ;;  %1102 = vrot.lane.b32.xlu0 %v1042_v44, %s2877_s9  ;;  %v993_v19 = vmul.f32 %v3409_v16, %v3273_v17  ;;  %v1050_v44 = vmul.f32 %v1024_v59, %v994_v58 }
 0x24b   : > { %1104 = vrot.lane.b32.xlu1 %v1043_v63, %s2877_s9  ;;  %v1048_v63 = vmul.f32 %v1024_v59, %v3411_v60 }
 0x24c   : > { %v1049_v37 = vmul.f32 %v1024_v59, %v993_v19 }
 0x252   : > { %1112 = vrot.lane.b32.xlu2 %v1047_v4, %s2877_s9  ;;  %1108 = vrot.lane.b32.xlu0 %v1045_v52, %s2877_s9  ;;  %v996_v4 = vmul.f32 %v3409_v16, %v3295_v6  ;;  %v1053_v52 = vmul.f32 %v1028_v56, %v997_v53 }
 0x253   : > { %1110 = vrot.lane.b32.xlu1 %v1046_v32, %s2877_s9  ;;  %v1051_v32 = vmul.f32 %v1028_v56, %v3411_v60 }
 0x254   : > { %v1052_v58 = vmul.f32 %v1028_v56, %v996_v4 }
 0x25a   : > { %1118 = vrot.lane.b32.xlu2 %v1050_v44, %s2877_s9  ;;  %1114 = vrot.lane.b32.xlu0 %v1048_v63, %s2877_s9 }
 0x25b   : > { %1116 = vrot.lane.b32.xlu1 %v1049_v37, %s2877_s9 }
 0x262   : > { %1124 = vrot.lane.b32.xlu2 %v1053_v52, %s2877_s9  ;;  %1120 = vrot.lane.b32.xlu0 %v1051_v32, %s2877_s9 }
 0x263   : > { %1122 = vrot.lane.b32.xlu1 %v1052_v58, %s2877_s9  ;;  %s190_s9 = scalar_lea.vmem [#allocation3], %s2574_s8 }
 0x26a   : > { %1200 = vperm.xlu2 %2712, %v2995_v14   ;;  %1192 = vperm.xlu0 %2710, %v3028_v25  }
 0x26b   : > { %1196 = vperm.xlu1 %2711, %v2968_v0  }
 0x272   : > { %1208 = vperm.xlu2 %2712, %v3014_v23   ;;  %1212 = vperm.xlu0 %2710, %v3021_v24  }
 0x273   : > { %1204 = vperm.xlu1 %2711, %v2974_v3  }
 0x27a   : > { %1220 = vperm.xlu2 %2712, %v3051_v29  }
 0x27b   : > { %1216 = vperm.xlu1 %2711, %v3042_v28  }
 0x284   : > { %v3487_v51 = vpop.permute.xlu2 %1082 }
 0x285   : > { %4787 = vst [vmem:[#allocation51_spill] sm:$0xff] %v3487_v51 }
 0x28c   : > { %v3489_v60 = vpop.permute.xlu2 %1088 }
 0x294   : > { %v3497_v44 = vpop.permute.xlu2 %1094 }
 0x295   : > { %4789 = vst [vmem:[#allocation53_spill] sm:$0xff] %v3497_v44 }
 0x29c   : > { %v3491_v16 = vpop.permute.xlu0 %1078  ;;  %v3505_v53 = vpop.permute.xlu2 %1100 }
 0x29d   : > { %v3493_v59 = vpop.permute.xlu1 %1080  ;;  %4793 = vst [vmem:[#allocation57_spill] sm:$0xff] %v3505_v53 }
 0x2a4   : > { %v3495_v19 = vpop.permute.xlu0 %1084  ;;  %v3511_v32 = vpop.permute.xlu2 %1106 }
 0x2a5   : > { %4788 = vst [vmem:[#allocation52_spill] sm:$0xff] %v3495_v19  ;;  %v3499_v63 = vpop.permute.xlu1 %1086 }
 0x2a6   : > { %4790 = vst [vmem:[#allocation54_spill] sm:$0xff] %v3499_v63 }
 0x2a7   : > { %4794 = vst [vmem:[#allocation58_spill] sm:$0xff] %v3511_v32 }
 0x2ac   : > { %v3501_v37 = vpop.permute.xlu0 %1090  ;;  %v3517_v19 = vpop.permute.xlu2 %1112 }
 0x2ad   : > { %4791 = vst [vmem:[#allocation55_spill] sm:$0xff] %v3501_v37  ;;  %v3503_v56 = vpop.permute.xlu1 %1092 }
 0x2ae   : > { %4792 = vst [vmem:[#allocation56_spill] sm:$0xff] %v3503_v56 }
 0x2af   : > { %4797 = vst [vmem:[#allocation61_spill] sm:$0xff] %v3517_v19 }
 0x2b4   : > { %v3507_v4 = vpop.permute.xlu0 %1096  ;;  %v3525_v56 = vpop.permute.xlu2 %1118 }
 0x2b5   : > { %v3509_v52 = vpop.permute.xlu1 %1098  ;;  %4801 = vst [vmem:[#allocation65_spill] sm:$0xff] %v3525_v56 }
 0x2bc   : > { %v3513_v58 = vpop.permute.xlu0 %1102  ;;  %v3533_v32 = vpop.permute.xlu2 %1124 }
 0x2bd   : > { %4795 = vst [vmem:[#allocation59_spill] sm:$0xff] %v3513_v58  ;;  %v3515_v27 = vpop.permute.xlu1 %1104 }
 0x2be   : > { %4796 = vst [vmem:[#allocation60_spill] sm:$0xff] %v3515_v27 }
 0x2bf   : > { %4804 = vst [vmem:[#allocation68_spill] sm:$0xff] %v3533_v32 }
 0x2c4   : > { %v3519_v44 = vpop.permute.xlu0 %1108  ;;  %v1201_v56 = vpop.permute.xlu2 %1200 }
 0x2c5   : > { %4798 = vst [vmem:[#allocation62_spill] sm:$0xff] %v3519_v44  ;;  %v3521_v49 = vpop.permute.xlu1 %1110  ;;  %v1228_v32 = vmul.f32 %v1201_v56, %v3186_v31 }
 0x2c6   : > { %4799 = vst [vmem:[#allocation63_spill] sm:$0xff] %v3521_v49 }
 0x2cc   : > { %v3523_v37 = vpop.permute.xlu0 %1114 }
 0x2cd   : > { %4800 = vst [vmem:[#allocation64_spill] sm:$0xff] %v3523_v37  ;;  %v3527_v53 = vpop.permute.xlu1 %1116 }
 0x2d4   : > { %v3529_v10 = vpop.permute.xlu0 %1120 }
 0x2d5   : > { %4802 = vst [vmem:[#allocation66_spill] sm:$0xff] %v3529_v10  ;;  %v3531_v63 = vpop.permute.xlu1 %1122  ;;  %v1227_v10 = vmul.f32 %v1201_v56, %v3218_v5 }
 0x2d6   : > { %4803 = vst [vmem:[#allocation67_spill] sm:$0xff] %v3531_v63 }
 0x2dc   : > { %v1193_v58 = vpop.permute.xlu0 %1192 }
 0x2dd   : > { %v1223_v27 = vmul.f32 %v1193_v58, %v3143_v1  ;;  %v1224_v19 = vmul.f32 %v1193_v58, %v3115_v48  ;;  %v1197_v44 = vpop.permute.xlu1 %1196  ;;  %v2879_v58 = vmov 5  }
 0x2de   : > { %v1225_v49 = vmul.f32 %v1197_v44, %v3167_v15  ;;  %v1226_v63 = vmul.f32 %v1197_v44, %v3163_v12  ;;  %2719 = vset.pattern.permute.xlu0 %v2879_v58  ;;  %2720 = vset.pattern.permute.xlu1 %v2879_v58 }
 0x2df   : > { %1255 = vrot.lane.b32.xlu0 %v1223_v27, %s2870_s12  ;;  %1257 = vrot.lane.b32.xlu1 %v1224_v19, %s2870_s12  ;;  %v1209_v19 = vpop.permute.xlu2 %1208 }
 0x2e0   : > { %1259 = vrot.lane.b32.xlu2 %v1225_v49, %s2870_s12  ;;  %v1231_v44 = vmul.f32 %v1209_v19, %v3262_v26 }
 0x2e1   : > { %2718 = vset.pattern.permute.xlu2 %v2879_v58 }
 0x2e5   : > { %v1205_v27 = vpop.permute.xlu1 %1204 }
 0x2e6   : > { %v1229_v49 = vmul.f32 %v1205_v27, %v3240_v33  ;;  %v1230_v37 = vmul.f32 %v1205_v27, %v3224_v9 }
 0x2e7   : > { %1263 = vrot.lane.b32.xlu1 %v1227_v10, %s2870_s12  ;;  %1261 = vrot.lane.b32.xlu0 %v1226_v63, %s2870_s12  ;;  %v1213_v10 = vpop.permute.xlu0 %1212  ;;  %v1232_v63 = vmul.f32 %v1209_v19, %v3233_v30  ;;  %v1221_v27 = vpop.permute.xlu2 %1220 }
 0x2e8   : > { %1265 = vrot.lane.b32.xlu2 %v1228_v32, %s2870_s12  ;;  %v1233_v56 = vmul.f32 %v1213_v10, %v3282_v20  ;;  %v1234_v32 = vmul.f32 %v1213_v10, %v3249_v11  ;;  %v1238_v19 = vmul.f32 %v1221_v27, %v3177_v22 }
 0x2ed   : > { %v1217_v58 = vpop.permute.xlu1 %1216 }
 0x2ef   : > { %1269 = vrot.lane.b32.xlu1 %v1230_v37, %s2870_s12  ;;  %1267 = vrot.lane.b32.xlu0 %v1229_v49, %s2870_s12  ;;  %v1235_v37 = vmul.f32 %v1217_v58, %v3273_v17  ;;  %v1236_v49 = vmul.f32 %v1217_v58, %v3154_v8 }
 0x2f0   : > { %1271 = vrot.lane.b32.xlu2 %v1231_v44, %s2870_s12  ;;  %v1237_v44 = vmul.f32 %v1221_v27, %v3295_v6 }
 0x2f7   : > { %1275 = vrot.lane.b32.xlu1 %v1233_v56, %s2870_s12  ;;  %1273 = vrot.lane.b32.xlu0 %v1232_v63, %s2870_s12 }
 0x2f8   : > { %1277 = vrot.lane.b32.xlu2 %v1234_v32, %s2870_s12 }
 0x2ff   : > { %1281 = vrot.lane.b32.xlu1 %v1236_v49, %s2870_s12  ;;  %1279 = vrot.lane.b32.xlu0 %v1235_v37, %s2870_s12 }
 0x300   : > { %1283 = vrot.lane.b32.xlu2 %v1237_v44, %s2870_s12 }
 0x307   : > { %2714 = vrot.lane.b32.xlu1 %v3082_v36, %s2880_s10  ;;  %1285 = vrot.lane.b32.xlu0 %v1238_v19, %s2870_s12  ;;  %s2881_s12 = smov 110   ;;  %s2611_s10 = sshll.u32 %s2938_s19, 6 }
 0x308   : > { %1401 = vperm.xlu2 %2718, %v3028_v25  }
 0x30f   : > { %1409 = vperm.xlu1 %2720, %v2995_v14   ;;  %1405 = vperm.xlu0 %2719, %v2968_v0  }
 0x310   : > { %1413 = vperm.xlu2 %2718, %v2974_v3  }
 0x317   : > { %1417 = vperm.xlu1 %2720, %v3014_v23   ;;  %1425 = vperm.xlu0 %2719, %v3042_v28  }
 0x318   : > { %1421 = vperm.xlu2 %2718, %v3021_v24  }
 0x31f   : > { %1429 = vperm.xlu1 %2720, %v3051_v29  }
 0x33a   : > { %v3576_v10 = vpop.permute.xlu2 %1259 }
 0x33b   : > { %4805 = vst [vmem:[#allocation69_spill] sm:$0xff] %v3576_v10 }
 0x342   : > { %v3582_v25 = vpop.permute.xlu2 %1265 }
 0x343   : > { %4807 = vst [vmem:[#allocation71_spill] sm:$0xff] %v3582_v25 }
 0x34a   : > { %v3588_v3 = vpop.permute.xlu2 %1271 }
 0x34b   : > { %4809 = vst [vmem:[#allocation73_spill] sm:$0xff] %v3588_v3 }
 0x351   : > { %v3578_v63 = vpop.permute.xlu0 %1255  ;;  %v3580_v56 = vpop.permute.xlu1 %1257 }
 0x352   : > { %4806 = vst [vmem:[#allocation70_spill] sm:$0xff] %v3580_v56  ;;  %v3594_v24 = vpop.permute.xlu2 %1277 }
 0x353   : > { %4811 = vst [vmem:[#allocation75_spill] sm:$0xff] %v3594_v24 }
 0x359   : > { %v3584_v14 = vpop.permute.xlu0 %1261  ;;  %v3586_v0 = vpop.permute.xlu1 %1263 }
 0x35a   : > { %4808 = vst [vmem:[#allocation72_spill] sm:$0xff] %v3586_v0  ;;  %v3614_v44 = vpop.permute.xlu2 %1283 }
 0x35b   : > { %4817 = vst [vmem:[#allocation81_spill] sm:$0xff] %v3614_v44 }
 0x361   : > { %v3590_v23 = vpop.permute.xlu0 %1267  ;;  %v3592_v28 = vpop.permute.xlu1 %1269 }
 0x362   : > { %4810 = vst [vmem:[#allocation74_spill] sm:$0xff] %v3592_v28 }
 0x369   : > { %v3596_v29 = vpop.permute.xlu0 %1273  ;;  %v3598_v32 = vpop.permute.xlu1 %1275 }
 0x36a   : > { %4812 = vst [vmem:[#allocation76_spill] sm:$0xff] %v3596_v29  ;;  %v3603_v58 = vsel %vm420_vm7, %v3598_v32, %v3594_v24 }
 0x36b   : > { %4813 = vst [vmem:[#allocation77_spill] sm:$0xff] %v3603_v58 }
 0x371   : > { %v3605_v27 = vpop.permute.xlu0 %1279  ;;  %v3607_v37 = vpop.permute.xlu1 %1281 }
 0x372   : > { %4814 = vst [vmem:[#allocation78_spill] sm:$0xff] %v3605_v27  ;;  %v3612_v49 = vsel %vm420_vm7, %v3605_v27, %v3607_v37 }
 0x373   : > { %4815 = vst [vmem:[#allocation79_spill] sm:$0xff] %v3607_v37 }
 0x374   : > { %4816 = vst [vmem:[#allocation80_spill] sm:$0xff] %v3612_v49  ;;  %v1402_v49 = vpop.permute.xlu2 %1401 }
 0x379   : > { %v3616_v19 = vpop.permute.xlu0 %1285  ;;  %v2715_v0 = vpop.permute.xlu1 %2714 }
 0x37a   : > { %4818 = vst [vmem:[#allocation82_spill] sm:$0xff] %v3616_v19  ;;  %v3621_v25 = vsel %vm420_vm7, %v3614_v44, %v3616_v19  ;;  %v2717_v36 = vunpack.i.h.bf16 %v2715_v0  ;;  %v3623_v58 = vunpack.i.l.bf16 %v2715_v0 }
 0x37b   : > { %4819 = vst [vmem:[#allocation83_spill] sm:$0xff] %v3621_v25 }
 0x37c   : > { %v3625_v24 = vmul.f32 0.0, %v2717_v36  ;;  %v3628_v3 = vsel %vm1371_vm8, %v3623_v58, %v2717_v36  ;;  %v1376_v37 = vmul.f32 %v3623_v58, %v3143_v1  ;;  %v1379_v36 = vmul.f32 %v3623_v58, %v3167_v15 }
 0x37d   : > { %v1377_v27 = vmul.f32 %v3628_v3, %v3115_v48 }
 0x37e   : > { %v1434_v29 = vmul.f32 %v1402_v49, %v3625_v24  ;;  %v1432_v28 = vmul.f32 %v1402_v49, %v1376_v37  ;;  %v1380_v37 = vmul.f32 %v3628_v3, %v3163_v12 }
 0x37f   : > { %v1433_v0 = vmul.f32 %v1402_v49, %v1377_v27 }
 0x380   : > { %1484 = vrot.lane.b32.xlu1 %v1434_v29, %s2881_s12  ;;  %1480 = vrot.lane.b32.xlu2 %v1432_v28, %s2881_s12  ;;  %v1382_v28 = vmul.f32 %v3623_v58, %v3218_v5 }
 0x381   : > { %v1406_v19 = vpop.permute.xlu0 %1405  ;;  %1482 = vrot.lane.b32.xlu0 %v1433_v0, %s2881_s12  ;;  %v1410_v48 = vpop.permute.xlu1 %1409  ;;  %v1383_v0 = vmul.f32 %v3628_v3, %v3186_v31 }
 0x382   : > { %v1435_v25 = vmul.f32 %v1406_v19, %v1379_v36  ;;  %v1437_v44 = vmul.f32 %v1406_v19, %v3625_v24  ;;  %v1436_v29 = vmul.f32 %v1406_v19, %v1380_v37  ;;  %v1438_v27 = vmul.f32 %v1410_v48, %v1382_v28  ;;  %v1414_v19 = vpop.permute.xlu2 %1413 }
 0x383   : > { %v1440_v49 = vmul.f32 %v1410_v48, %v3625_v24  ;;  %v1386_v36 = vmul.f32 %v3628_v3, %v3224_v9  ;;  %v1443_v37 = vmul.f32 %v1414_v19, %v3625_v24 }
 0x385   : > { %v1442_v28 = vmul.f32 %v1414_v19, %v1386_v36  ;;  %v1391_v36 = vmul.f32 %v3623_v58, %v3282_v20 }
 0x388   : > { %1490 = vrot.lane.b32.xlu1 %v1437_v44, %s2881_s12  ;;  %1486 = vrot.lane.b32.xlu2 %v1435_v25, %s2881_s12  ;;  %v1439_v44 = vmul.f32 %v1410_v48, %v1383_v0  ;;  %v1385_v25 = vmul.f32 %v3623_v58, %v3240_v33  ;;  %v1388_v48 = vmul.f32 %v3623_v58, %v3262_v26 }
 0x389   : > { %1488 = vrot.lane.b32.xlu0 %v1436_v29, %s2881_s12 }
 0x38a   : > { %v1441_v29 = vmul.f32 %v1414_v19, %v1385_v25  ;;  %v1389_v25 = vmul.f32 %v3628_v3, %v3233_v30 }
 0x390   : > { %1496 = vrot.lane.b32.xlu1 %v1440_v49, %s2881_s12  ;;  %1492 = vrot.lane.b32.xlu2 %v1438_v27, %s2881_s12  ;;  %v1418_v49 = vpop.permute.xlu1 %1417  ;;  %v2882_v27 = vmov 6  }
 0x391   : > { %1494 = vrot.lane.b32.xlu0 %v1439_v44, %s2881_s12  ;;  %2727 = vset.pattern.permute.xlu1 %v2882_v27  ;;  %v1444_v0 = vmul.f32 %v1418_v49, %v1388_v48  ;;  %v1446_v44 = vmul.f32 %v1418_v49, %v3625_v24  ;;  %v1445_v19 = vmul.f32 %v1418_v49, %v1389_v25 }
 0x392   : > { %2726 = vset.pattern.permute.xlu0 %v2882_v27  ;;  %2728 = vset.pattern.permute.xlu2 %v2882_v27  ;;  %v1394_v49 = vmul.f32 %v3623_v58, %v3273_v17 }
 0x398   : > { %1502 = vrot.lane.b32.xlu1 %v1443_v37, %s2881_s12  ;;  %1498 = vrot.lane.b32.xlu2 %v1441_v29, %s2881_s12  ;;  %v1422_v37 = vpop.permute.xlu2 %1421  ;;  %v1392_v29 = vmul.f32 %v3628_v3, %v3249_v11 }
 0x399   : > { %1500 = vrot.lane.b32.xlu0 %v1442_v28, %s2881_s12  ;;  %v1447_v28 = vmul.f32 %v1422_v37, %v1391_v36  ;;  %v1449_v48 = vmul.f32 %v1422_v37, %v3625_v24 }
 0x39a   : > { %v1448_v27 = vmul.f32 %v1422_v37, %v1392_v29  ;;  %v1397_v37 = vmul.f32 %v3623_v58, %v3295_v6  ;;  %v3716_v58 = vld [vmem:[%s4664_s2 + $0x10] sm:$0xff] }
 0x3a0   : > { %1508 = vrot.lane.b32.xlu1 %v1446_v44, %s2881_s12  ;;  %1504 = vrot.lane.b32.xlu2 %v1444_v0, %s2881_s12  ;;  %v1426_v44 = vpop.permute.xlu0 %1425 }
 0x3a1   : > { %1506 = vrot.lane.b32.xlu0 %v1445_v19, %s2881_s12  ;;  %v1450_v0 = vmul.f32 %v1426_v44, %v1394_v49  ;;  %v1452_v25 = vmul.f32 %v1426_v44, %v3625_v24  ;;  %v1395_v19 = vmul.f32 %v3628_v3, %v3154_v8 }
 0x3a3   : > { %v1451_v36 = vmul.f32 %v1426_v44, %v1395_v19  ;;  %v3697_v44 = vld [vmem:[%s4664_s2 + $0x8] sm:$0xff]  ;;  %v674_v19 = vsel %vm673_vm6, %v3202_v50, %v3353_v34  ;;  %v902_v50 = vsel %vm901_vm9, %v3315_v61, %v3302_v47  ;;  %v3761_v61 = vunpack.i.h.bf16 %v3105_v43 }
 0x3a8   : > { %1514 = vrot.lane.b32.xlu1 %v1449_v48, %s2881_s12  ;;  %1510 = vrot.lane.b32.xlu2 %v1447_v28, %s2881_s12  ;;  %v1430_v48 = vpop.permute.xlu1 %1429 }
 0x3a9   : > { %1512 = vrot.lane.b32.xlu0 %v1448_v27, %s2881_s12  ;;  %v1453_v29 = vmul.f32 %v1430_v48, %v1397_v37  ;;  %v1455_v28 = vmul.f32 %v1430_v48, %v3625_v24  ;;  %v1398_v27 = vmul.f32 %v3628_v3, %v3177_v22  ;;  %v3704_v3 = vld [vmem:[%s4664_s2] sm:$0xff]  ;;  %v3710_v24 = vld [vmem:[%s4664_s2 + $0x18] sm:$0xff] }
 0x3aa   : > { %v3742_v37 = vld [vmem:[%s4664_s2 + $0x20] sm:$0xff] }
 0x3ab   : > { %v1454_v49 = vmul.f32 %v1430_v48, %v1398_v27  ;;  %v3736_v48 = vld [vmem:[%s4664_s2 + $0x30] sm:$0xff]  ;;  %4823 = vst [vmem:[#allocation87_spill] sm:$0xff] %v3742_v37 }
 0x3ac   : > { %4822 = vst [vmem:[#allocation86_spill] sm:$0xff] %v3736_v48 }
 0x3b0   : > { %1520 = vrot.lane.b32.xlu1 %v1452_v25, %s2881_s12  ;;  %1516 = vrot.lane.b32.xlu2 %v1450_v0, %s2881_s12  ;;  %v3723_v0 = vld [vmem:[%s4664_s2 + $0x28] sm:$0xff] }
 0x3b1   : > { %1518 = vrot.lane.b32.xlu0 %v1451_v36, %s2881_s12  ;;  %4820 = vst [vmem:[#allocation84_spill] sm:$0xff] %v3723_v0 }
 0x3b8   : > { %1526 = vrot.lane.b32.xlu1 %v1455_v28, %s2881_s12  ;;  %1522 = vrot.lane.b32.xlu2 %v1453_v29, %s2881_s12  ;;  %v1127_v28 = vsel %vm1126_vm10, %v3491_v16, %v3493_v59 }
 0x3b9   : > { %1524 = vrot.lane.b32.xlu0 %v1454_v49, %s2881_s12 }
 0x3c0   : > { %1631 = vperm.xlu1 %2727, %v3697_v44   ;;  %2722 = vrot.lane.b32.xlu2 %v3000_v18, %s2883_s14  ;;  %v2686_v18 = vunpack.i.l.bf16 %v3105_v43  ;;  %v675_v43 = vsel %vm673_vm6, %v3353_v34, %v3293_v38  ;;  %v903_v34 = vsel %vm901_vm9, %v3302_v47, %v3361_v7  ;;  %s2888_s14 = smov 95  }
 0x3c1   : > { %1627 = vperm.xlu0 %2726, %v3704_v3  }
 0x3c2   : > { %v3726_v25 = vmul.f32 0.0, %v2686_v18  ;;  %v3767_v16 = vsel %vm420_vm7, %v2686_v18, %v3761_v61 }
 0x3c4   : > { %4821 = vst [vmem:[#allocation85_spill] sm:$0xff] %v3726_v25  ;;  %v497_v36 = vmul.f32 %v3111_v46, %v3726_v25 }
 0x3c6   : > { %v714_v29 = vadd.f32 %v674_v19, %v497_v36 }
 0x3c8   : > { %1639 = vperm.xlu1 %2727, %v3710_v24   ;;  %1635 = vperm.xlu2 %2728, %v3716_v58   ;;  %v942_v27 = vadd.f32 %v902_v50, %v714_v29  ;;  %v680_v29 = vsel %vm673_vm6, %v3208_v57, %v3379_v42  ;;  %v426_v50 = vmul.f32 %v3767_v16, %v3143_v1 }
 0x3c9   : > { %1647 = vperm.xlu0 %2726, %v3723_v0   ;;  %v1133_v57 = vsel %vm1126_vm10, %v3507_v4, %v3509_v52 }
 0x3ca   : > { %v1167_v49 = vadd.f32 %v1127_v28, %v942_v27  ;;  %v506_v28 = vmul.f32 %v3097_v39, %v3726_v25  ;;  %v498_v18 = vmul.f32 %v3111_v46, %v426_v50  ;;  %v1128_v50 = vsel %vm1126_vm10, %v3493_v59, %v3487_v51 }
 0x3cb   : > { %v684_v51 = vsel %vm673_vm6, %v3212_v62, %v3391_v41 }
 0x3cc   : > { %v1319_v19 = vadd.f32 %v3578_v63, %v1167_v49  ;;  %v723_v27 = vadd.f32 %v680_v29, %v506_v28  ;;  %v429_v29 = vmul.f32 %v3767_v16, %v3167_v15 }
 0x3d0   : > { %1651 = vperm.xlu1 %2727, %v3736_v48   ;;  %1643 = vperm.xlu2 %2728, %v3742_v37   ;;  %v3754_v48 = vld [vmem:[%s4664_s2 + $0x38] sm:$0xff] }
 0x3d1   : > { %4824 = vst [vmem:[#allocation88_spill] sm:$0xff] %v3754_v48 }
 0x3d8   : > { %1655 = vperm.xlu2 %2728, %v3754_v48  }
 0x3da   : > { %v1481_v36 = vpop.permute.xlu2 %1480 }
 0x3db   : > { %v3758_v37 = vadd.f32 %v1481_v36, %v1319_v19  ;;  %v908_v19 = vsel %vm901_vm9, %v3336_v55, %v3363_v54  ;;  %v430_v55 = vmul.f32 %v3761_v61, %v3163_v12 }
 0x3dc   : > { %v951_v48 = vadd.f32 %v908_v19, %v723_v27  ;;  %v677_v27 = vsel %vm673_vm6, %v3365_v13, %v3321_v2 }
 0x3dd   : > { %4825 = vst [vmem:[#allocation89_spill] sm:$0xff] %v3758_v37  ;;  %v715_v37 = vadd.f32 %v675_v43, %v498_v18  ;;  %v501_v18 = vmul.f32 %v3099_v40, %v429_v29 }
 0x3de   : > { %v1176_v28 = vadd.f32 %v1133_v57, %v951_v48  ;;  %v1287_v48 = vsel %vm420_vm7, %v3578_v63, %v3580_v56 }
 0x3df   : > { %v943_v38 = vadd.f32 %v903_v34, %v715_v37  ;;  %v502_v37 = vmul.f32 %v3099_v40, %v430_v55  ;;  %v718_v57 = vadd.f32 %v677_v27, %v501_v18  ;;  %v905_v55 = vsel %vm901_vm9, %v3330_v35, %v3369_v21 }
 0x3e0   : > { %v1328_v4 = vadd.f32 %v3590_v23, %v1176_v28 }
 0x3e1   : > { %v1168_v59 = vadd.f32 %v1128_v50, %v943_v38  ;;  %v512_v38 = vmul.f32 %v3109_v45, %v3726_v25  ;;  %v719_v29 = vadd.f32 %v3321_v2, %v502_v37 }
 0x3e2   : > { %v3763_v0 = vpop.permute.xlu2 %1486 }
 0x3e3   : > { %4826 = vst [vmem:[#allocation90_spill] sm:$0xff] %v3763_v0  ;;  %v1320_v28 = vadd.f32 %v1287_v48, %v1168_v59  ;;  %v729_v27 = vadd.f32 %v684_v51, %v512_v38  ;;  %v946_v48 = vadd.f32 %v905_v55, %v718_v57 }
 0x3ea   : > { %v3779_v49 = vpop.permute.xlu2 %1492 }
 0x3eb   : > { %4827 = vst [vmem:[#allocation91_spill] sm:$0xff] %v3779_v49 }
 0x3f2   : > { %v1485_v43 = vpop.permute.xlu1 %1484  ;;  %v3805_v47 = vpop.permute.xlu2 %1498 }
 0x3f3   : > { %v3809_v19 = vadd.f32 %v3805_v47, %v1328_v4  ;;  %v1483_v34 = vpop.permute.xlu0 %1482  ;;  %v4831_v4 = vld [vmem:[#allocation54_spill] sm:$0xff] }
 0x3f4   : > { %v1529_v63 = vsel %vm1528_vm11, %v1481_v36, %v1483_v34  ;;  %v3817_v56 = vsel %vm1528_vm11, %v1483_v34, %v1485_v43  ;;  %v1130_v62 = vsel %vm1126_vm10, %v4831_v4, %v3489_v60  ;;  %v947_v36 = vadd.f32 %v3369_v21, %v719_v29  ;;  %v4833_v34 = vld [vmem:[#allocation29_spill] sm:$0xff]  ;;  %v4859_v4 = vld [vmem:[#allocation74_spill] sm:$0xff] }
 0x3f5   : > { %4828 = vst [vmem:[#allocation92_spill] sm:$0xff] %v3809_v19  ;;  %v3822_v50 = vadd.f32 %v1529_v63, %v1320_v28  ;;  %v1288_v43 = vsel %vm420_vm7, %v3576_v10, %v3584_v14  ;;  %v1171_v37 = vadd.f32 %v1130_v62, %v946_v48  ;;  %v4832_v28 = vld [vmem:[#allocation43_spill] sm:$0xff] }
 0x3f6   : > { %4829 = vst [vmem:[#allocation93_spill] sm:$0xff] %v3817_v56  ;;  %v1172_v59 = vadd.f32 %v3489_v60, %v947_v36  ;;  %v912_v63 = vsel %vm901_vm9, %v4833_v34, %v4832_v28  ;;  %v4834_v19 = vld [vmem:[#allocation63_spill] sm:$0xff]  ;;  %v435_v60 = vmul.f32 %v3767_v16, %v3240_v33  ;;  %v4838_v34 = vld [vmem:[#allocation32_spill] sm:$0xff] }
 0x3f7   : > { %4830 = vst [vmem:[#allocation94_spill] sm:$0xff] %v3822_v50  ;;  %v4835_v50 = vld [vmem:[#allocation62_spill] sm:$0xff]  ;;  %v1323_v51 = vadd.f32 %v1288_v43, %v1171_v37  ;;  %v957_v38 = vadd.f32 %v912_v63, %v729_v27  ;;  %v4841_v37 = vld [vmem:[#allocation31_spill] sm:$0xff] }
 0x3f8   : > { %v1137_v21 = vsel %vm1126_vm10, %v4835_v50, %v4834_v19  ;;  %v1324_v57 = vadd.f32 %v3584_v14, %v1172_v59  ;;  %v4839_v50 = vld [vmem:[#allocation17_spill] sm:$0xff]  ;;  %v4840_v14 = vld [vmem:[#allocation11_spill] sm:$0xff]  ;;  %v4842_v63 = vld [vmem:[#allocation46_spill] sm:$0xff] }
 0x3f9   : > { %v1182_v62 = vadd.f32 %v1137_v21, %v957_v38  ;;  %v686_v43 = vsel %vm673_vm6, %v4839_v50, %v4838_v34  ;;  %v515_v27 = vmul.f32 %v4840_v14, %v3726_v25  ;;  %v507_v38 = vmul.f32 %v3097_v39, %v435_v60  ;;  %v4845_v50 = vld [vmem:[#allocation64_spill] sm:$0xff]  ;;  %v4854_v39 = vld [vmem:[#allocation9_spill] sm:$0xff] }
 0x3fa   : > { %v1491_v18 = vpop.permute.xlu1 %1490  ;;  %v3834_v2 = vpop.permute.xlu2 %1504  ;;  %v439_v60 = vmul.f32 %v3761_v61, %v3233_v30 }
 0x3fb   : > { %v1489_v29 = vpop.permute.xlu0 %1488  ;;  %v1334_v59 = vadd.f32 %v3598_v32, %v1182_v62  ;;  %v1139_v32 = vsel %vm1126_vm10, %v4845_v50, %v3527_v53  ;;  %v4851_v50 = vld [vmem:[#allocation57_spill] sm:$0xff] }
 0x3fc   : > { %v1531_v55 = vsel %vm1528_vm11, %v3763_v0, %v1489_v29  ;;  %v1532_v10 = vsel %vm1528_vm11, %v1489_v29, %v1491_v18  ;;  %v681_v18 = vsel %vm673_vm6, %v3379_v42, %v4841_v37  ;;  %v4843_v29 = vld [vmem:[#allocation45_spill] sm:$0xff]  ;;  %v438_v37 = vmul.f32 %v3767_v16, %v3262_v26  ;;  %v4858_v0 = vld [vmem:[#allocation47_spill] sm:$0xff] }
 0x3fd   : > { %v3849_v36 = vadd.f32 %v1531_v55, %v1323_v51  ;;  %v3851_v48 = vadd.f32 %v1532_v10, %v1324_v57  ;;  %v914_v21 = vsel %vm901_vm9, %v4843_v29, %v4842_v63  ;;  %v732_v57 = vadd.f32 %v686_v43, %v515_v27 }
 0x3fe   : > { %v724_v62 = vadd.f32 %v681_v18, %v507_v38 }
 0x3ff   : > { %4836 = vst [vmem:[#allocation43_spill] sm:$0xff] %v3849_v36  ;;  %v960_v36 = vadd.f32 %v914_v21, %v732_v57  ;;  %v4849_v21 = vld [vmem:[#allocation34_spill] sm:$0xff] }
 0x400   : > { %4837 = vst [vmem:[#allocation29_spill] sm:$0xff] %v3851_v48  ;;  %v4850_v57 = vld [vmem:[#allocation18_spill] sm:$0xff]  ;;  %v4856_v48 = vld [vmem:[#allocation41_spill] sm:$0xff] }
 0x401   : > { %v1185_v27 = vadd.f32 %v1139_v32, %v960_v36  ;;  %v688_v38 = vsel %vm673_vm6, %v4850_v57, %v4849_v21  ;;  %v510_v36 = vmul.f32 %v4854_v39, %v438_v37  ;;  %v4855_v32 = vld [vmem:[#allocation35_spill] sm:$0xff] }
 0x402   : > { %v1497_v51 = vpop.permute.xlu1 %1496  ;;  %v3865_v10 = vpop.permute.xlu2 %1510 }
 0x403   : > { %v3869_v55 = vadd.f32 %v3865_v10, %v1334_v59  ;;  %v1495_v42 = vpop.permute.xlu0 %1494  ;;  %v4848_v59 = vld [vmem:[#allocation39_spill] sm:$0xff] }
 0x404   : > { %v3878_v29 = vsel %vm1528_vm11, %v3779_v49, %v1495_v42  ;;  %v3881_v43 = vsel %vm1528_vm11, %v1495_v42, %v1497_v51  ;;  %v909_v18 = vsel %vm901_vm9, %v3363_v54, %v4848_v59  ;;  %v683_v54 = vsel %vm673_vm6, %v4856_v48, %v4855_v32  ;;  %v4857_v59 = vld [vmem:[#allocation49_spill] sm:$0xff]  ;;  %v4862_v48 = vld [vmem:[#allocation66_spill] sm:$0xff] }
 0x405   : > { %4844 = vst [vmem:[#allocation63_spill] sm:$0xff] %v3869_v55  ;;  %v1134_v55 = vsel %vm1126_vm10, %v3509_v52, %v4851_v50  ;;  %v952_v42 = vadd.f32 %v909_v18, %v724_v62  ;;  %v916_v57 = vsel %vm901_vm9, %v4858_v0, %v4857_v59  ;;  %v1290_v52 = vsel %vm420_vm7, %v3590_v23, %v4859_v4  ;;  %v4861_v18 = vld [vmem:[#allocation67_spill] sm:$0xff] }
 0x406   : > { %4846 = vst [vmem:[#allocation62_spill] sm:$0xff] %v3878_v29  ;;  %v4852_v29 = vld [vmem:[#allocation13_spill] sm:$0xff]  ;;  %v511_v62 = vmul.f32 %v4854_v39, %v439_v60  ;;  %v1141_v35 = vsel %vm1126_vm10, %v4862_v48, %v4861_v18  ;;  %v727_v40 = vadd.f32 %v683_v54, %v510_v36  ;;  %v441_v4 = vmul.f32 %v3767_v16, %v3282_v20  ;;  %v4867_v54 = vld [vmem:[#allocation60_spill] sm:$0xff] }
 0x407   : > { %4847 = vst [vmem:[#allocation32_spill] sm:$0xff] %v3881_v43  ;;  %v518_v51 = vmul.f32 %v4852_v29, %v3726_v25  ;;  %v4853_v43 = vld [vmem:[#allocation78_spill] sm:$0xff] }
 0x408   : > { %v1337_v49 = vadd.f32 %v4853_v43, %v1185_v27  ;;  %v1177_v27 = vadd.f32 %v1134_v55, %v952_v42  ;;  %v728_v0 = vadd.f32 %v4855_v32, %v511_v62  ;;  %v4865_v42 = vld [vmem:[#allocation38_spill] sm:$0xff]  ;;  %v4868_v62 = vld [vmem:[#allocation81_spill] sm:$0xff] }
 0x409   : > { %v735_v43 = vadd.f32 %v688_v38, %v518_v51  ;;  %v4864_v51 = vld [vmem:[#allocation42_spill] sm:$0xff] }
 0x40a   : > { %v1503_v50 = vpop.permute.xlu1 %1502  ;;  %v3907_v56 = vpop.permute.xlu2 %1516  ;;  %v1329_v13 = vadd.f32 %v1290_v52, %v1177_v27  ;;  %v911_v36 = vsel %vm901_vm9, %v4865_v42, %v4864_v51  ;;  %v4866_v32 = vld [vmem:[#allocation58_spill] sm:$0xff]  ;;  %v956_v52 = vadd.f32 %v4864_v51, %v728_v0  ;;  %v4869_v27 = vld [vmem:[#allocation40_spill] sm:$0xff] }
 0x40b   : > { %v3911_v37 = vadd.f32 %v3907_v56, %v1337_v49  ;;  %v963_v25 = vadd.f32 %v916_v57, %v735_v43  ;;  %v1501_v23 = vpop.permute.xlu0 %1500  ;;  %v442_v49 = vmul.f32 %v3761_v61, %v3249_v11  ;;  %v1136_v57 = vsel %vm1126_vm10, %v4867_v54, %v4866_v32 }
 0x40c   : > { %v1535_v60 = vsel %vm1528_vm11, %v3805_v47, %v1501_v23  ;;  %v3922_v55 = vsel %vm1528_vm11, %v1501_v23, %v1503_v50  ;;  %v955_v47 = vadd.f32 %v911_v36, %v727_v40  ;;  %v513_v43 = vmul.f32 %v3109_v45, %v441_v4 }
 0x40d   : > { %4860 = vst [vmem:[#allocation17_spill] sm:$0xff] %v3911_v37  ;;  %v1188_v38 = vadd.f32 %v1141_v35, %v963_v25  ;;  %v3926_v48 = vadd.f32 %v1535_v60, %v1329_v13  ;;  %v685_v35 = vsel %vm673_vm6, %v3391_v41, %v4869_v27  ;;  %v4870_v13 = vld [vmem:[#allocation76_spill] sm:$0xff]  ;;  %v4871_v25 = vld [vmem:[#allocation73_spill] sm:$0xff]  ;;  %v514_v11 = vmul.f32 %v3109_v45, %v442_v49 }
 0x40e   : > { %v1291_v23 = vsel %vm420_vm7, %v4871_v25, %v4870_v13  ;;  %v1181_v0 = vadd.f32 %v4866_v32, %v956_v52  ;;  %v1180_v40 = vadd.f32 %v1136_v57, %v955_v47  ;;  %v730_v51 = vadd.f32 %v685_v35, %v513_v43  ;;  %v4873_v49 = vld [vmem:[#allocation44_spill] sm:$0xff]  ;;  %v4874_v57 = vld [vmem:[#allocation61_spill] sm:$0xff] }
 0x40f   : > { %4863 = vst [vmem:[#allocation11_spill] sm:$0xff] %v3926_v48  ;;  %v1340_v50 = vadd.f32 %v4868_v62, %v1188_v38  ;;  %v731_v4 = vadd.f32 %v4869_v27, %v514_v11  ;;  %v913_v32 = vsel %vm901_vm9, %v4832_v28, %v4873_v49  ;;  %v1138_v11 = vsel %vm1126_vm10, %v4834_v19, %v4874_v57 }
 0x410   : > { %v1332_v36 = vadd.f32 %v1291_v23, %v1180_v40  ;;  %v1333_v41 = vadd.f32 %v4870_v13, %v1181_v0  ;;  %v445_v52 = vmul.f32 %v3761_v61, %v3154_v8  ;;  %v444_v47 = vmul.f32 %v3767_v16, %v3273_v17  ;;  %v4877_v40 = vld [vmem:[#allocation77_spill] sm:$0xff] }
 0x412   : > { %v1509_v60 = vpop.permute.xlu1 %1508  ;;  %v3943_v37 = vpop.permute.xlu2 %1522  ;;  %v517_v19 = vmul.f32 %v4840_v14, %v445_v52  ;;  %v516_v23 = vmul.f32 %v4840_v14, %v444_v47  ;;  %v4881_v52 = vld [vmem:[#allocation65_spill] sm:$0xff] }
 0x413   : > { %v3948_v38 = vadd.f32 %v3943_v37, %v1340_v50  ;;  %v1507_v62 = vpop.permute.xlu0 %1506  ;;  %v959_v50 = vadd.f32 %v4873_v49, %v731_v4  ;;  %v4878_v4 = vld [vmem:[#allocation48_spill] sm:$0xff]  ;;  %v1140_v47 = vsel %vm1126_vm10, %v3527_v53, %v4881_v52 }
 0x414   : > { %v1537_v20 = vsel %vm1528_vm11, %v3834_v2, %v1507_v62  ;;  %v1538_v25 = vsel %vm1528_vm11, %v1507_v62, %v1509_v60  ;;  %v4876_v60 = vld [vmem:[#allocation75_spill] sm:$0xff] }
 0x415   : > { %v3955_v48 = vadd.f32 %v1537_v20, %v1332_v36  ;;  %v3957_v45 = vadd.f32 %v1538_v25, %v1333_v41  ;;  %v958_v20 = vadd.f32 %v913_v32, %v730_v51  ;;  %v1184_v35 = vadd.f32 %v4874_v57, %v959_v50  ;;  %v4875_v25 = vld [vmem:[#allocation22_spill] sm:$0xff] }
 0x416   : > { %v687_v28 = vsel %vm673_vm6, %v4838_v34, %v4875_v25  ;;  %v915_v51 = vsel %vm901_vm9, %v4842_v63, %v4878_v4  ;;  %v734_v34 = vadd.f32 %v4875_v25, %v517_v19 }
 0x417   : > { %4872 = vst [vmem:[#allocation46_spill] sm:$0xff] %v3957_v45  ;;  %v1183_v13 = vadd.f32 %v1138_v11, %v958_v20  ;;  %v1336_v0 = vadd.f32 %v4876_v60, %v1184_v35  ;;  %v733_v32 = vadd.f32 %v687_v28, %v516_v23  ;;  %v448_v11 = vmul.f32 %v3761_v61, %v3177_v22  ;;  %v4882_v28 = vld [vmem:[#allocation26_spill] sm:$0xff]  ;;  %v4883_v23 = vld [vmem:[#allocation80_spill] sm:$0xff] }
 0x418   : > { %v962_v63 = vadd.f32 %v4878_v4, %v734_v34  ;;  %v689_v19 = vsel %vm673_vm6, %v4849_v21, %v4882_v28  ;;  %v4925_v45 = vld [vmem:[#allocation72_spill] sm:$0xff] }
 0x419   : > { %v1335_v36 = vadd.f32 %v4877_v40, %v1183_v13  ;;  %v961_v50 = vadd.f32 %v915_v51, %v733_v32  ;;  %v520_v25 = vmul.f32 %v4852_v29, %v448_v11  ;;  %v4885_v51 = vld [vmem:[#allocation50_spill] sm:$0xff] }
 0x41a   : > { %v1515_v43 = vpop.permute.xlu1 %1514  ;;  %v2723_v27 = vpop.permute.xlu2 %2722  ;;  %v1187_v35 = vadd.f32 %v4881_v52, %v962_v63  ;;  %v4886_v52 = vld [vmem:[#allocation68_spill] sm:$0xff] }
 0x41b   : > { %v1513_v41 = vpop.permute.xlu0 %1512  ;;  %v1186_v13 = vadd.f32 %v1140_v47, %v961_v50  ;;  %v737_v4 = vadd.f32 %v4882_v28, %v520_v25  ;;  %v1142_v47 = vsel %vm1126_vm10, %v4861_v18, %v4886_v52  ;;  %v4888_v28 = vld [vmem:[#allocation82_spill] sm:$0xff] }
 0x41c   : > { %v1539_v62 = vsel %vm1528_vm11, %v3865_v10, %v1513_v41  ;;  %v1540_v49 = vsel %vm1528_vm11, %v1513_v41, %v1515_v43  ;;  %v447_v10 = vmul.f32 %v3767_v16, %v3295_v6 }
 0x41d   : > { %v3985_v57 = vadd.f32 %v1539_v62, %v1335_v36  ;;  %v3987_v14 = vadd.f32 %v1540_v49, %v1336_v0  ;;  %v1338_v60 = vadd.f32 %v4883_v23, %v1186_v13  ;;  %v4884_v0 = vld [vmem:[#allocation79_spill] sm:$0xff]  ;;  %v2725_v36 = vunpack.i.h.bf16 %v2723_v27 }
 0x41e   : > { %v519_v53 = vmul.f32 %v4852_v29, %v447_v10  ;;  %v1339_v40 = vadd.f32 %v4884_v0, %v1187_v35  ;;  %v917_v62 = vsel %vm901_vm9, %v4857_v59, %v4885_v51  ;;  %v965_v63 = vadd.f32 %v4885_v51, %v737_v4  ;;  %v4887_v13 = vld [vmem:[#allocation83_spill] sm:$0xff]  ;;  %v4889_v51 = vld [vmem:[#allocation12_spill] sm:$0xff] }
 0x41f   : > { %4879 = vst [vmem:[#allocation45_spill] sm:$0xff] %v3985_v57  ;;  %v4014_v32 = vmul.f32 0.0, %v2725_v36 }
 0x420   : > { %4880 = vst [vmem:[#allocation64_spill] sm:$0xff] %v3987_v14  ;;  %v736_v21 = vadd.f32 %v689_v19, %v519_v53  ;;  %v1190_v50 = vadd.f32 %v4886_v52, %v965_v63  ;;  %v4030_v53 = vunpack.i.l.bf16 %v2723_v27  ;;  %v4930_v14 = vld [vmem:[#allocation39_spill] sm:$0xff] }
 0x422   : > { %v1521_v20 = vpop.permute.xlu1 %1520  ;;  %v3997_v43 = vpop.permute.xlu2 %1635  ;;  %v964_v10 = vadd.f32 %v917_v62, %v736_v21  ;;  %v1342_v19 = vadd.f32 %v4888_v28, %v1190_v50  ;;  %v1602_v4 = vmul.f32 %v4030_v53, %v3143_v1  ;;  %v2886_v21 = vmov 8  }
 0x423   : > { %v1519_v41 = vpop.permute.xlu0 %1518  ;;  %2736 = vset.pattern.permute.xlu2 %v2886_v21  ;;  %v1605_v63 = vmul.f32 %v4030_v53, %v3167_v15  ;;  %v1666_v28 = vmul.f32 %v3997_v43, %v4014_v32 }
 0x424   : > { %v1541_v49 = vsel %vm1528_vm11, %v3907_v56, %v1519_v41  ;;  %v1542_v34 = vsel %vm1528_vm11, %v1519_v41, %v1521_v20  ;;  %v1189_v56 = vadd.f32 %v1142_v47, %v964_v10  ;;  %v4040_v41 = vsel %vm1597_vm12, %v4030_v53, %v2725_v36 }
 0x425   : > { %v4016_v29 = vadd.f32 %v1541_v49, %v1338_v60  ;;  %v4018_v11 = vadd.f32 %v1542_v34, %v1339_v40  ;;  %v1603_v27 = vmul.f32 %v4040_v41, %v4889_v51  ;;  %v2885_v36 = vmov 7  }
 0x426   : > { %v1341_v25 = vadd.f32 %v4887_v13, %v1189_v56  ;;  %2735 = vset.pattern.permute.xlu1 %v2885_v36  ;;  %2734 = vset.pattern.permute.xlu0 %v2885_v36  ;;  %v1606_v47 = vmul.f32 %v4040_v41, %v3163_v12  ;;  %v1608_v13 = vmul.f32 %v4030_v53, %v3218_v5 }
 0x42a   : > { %v1644_v59 = vpop.permute.xlu2 %1643  ;;  %v1527_v35 = vpop.permute.xlu1 %1526 }
 0x42b   : > { %v4026_v20 = vmul.f32 %v1644_v59, %v4014_v32  ;;  %v1525_v23 = vpop.permute.xlu0 %1524 }
 0x42c   : > { %v1543_v18 = vsel %vm1528_vm11, %v3943_v37, %v1525_v23  ;;  %v1544_v60 = vsel %vm1528_vm11, %v1525_v23, %v1527_v35  ;;  %v1609_v35 = vmul.f32 %v4040_v41, %v3186_v31 }
 0x42d   : > { %v4035_v0 = vadd.f32 %v1543_v18, %v1341_v25  ;;  %v4037_v40 = vadd.f32 %v1544_v60, %v1342_v19  ;;  %v1664_v19 = vmul.f32 %v3997_v43, %v1608_v13  ;;  %v1612_v18 = vmul.f32 %v4040_v41, %v3224_v9  ;;  %v4897_v13 = vld [vmem:[#allocation14_spill] sm:$0xff] }
 0x42e   : > { %v1665_v25 = vmul.f32 %v3997_v43, %v1609_v35  ;;  %v1611_v60 = vmul.f32 %v4030_v53, %v3240_v33  ;;  %v1615_v43 = vmul.f32 %v4040_v41, %v3233_v30 }
 0x432   : > { %v1632_v52 = vpop.permute.xlu1 %1631 }
 0x433   : > { %v1628_v62 = vpop.permute.xlu0 %1627  ;;  %v1662_v10 = vmul.f32 %v1632_v52, %v1606_v47  ;;  %v1663_v50 = vmul.f32 %v1632_v52, %v4014_v32  ;;  %v1661_v56 = vmul.f32 %v1632_v52, %v1605_v63  ;;  %v4890_v52 = vld [vmem:[#allocation6_spill] sm:$0xff]  ;;  %v4892_v47 = vld [vmem:[#allocation84_spill] sm:$0xff] }
 0x434   : > { %v1658_v49 = vmul.f32 %v1628_v62, %v1602_v4  ;;  %v1659_v34 = vmul.f32 %v1628_v62, %v1603_v27  ;;  %v1660_v37 = vmul.f32 %v1628_v62, %v4014_v32  ;;  %v4893_v63 = vld [vmem:[#allocation86_spill] sm:$0xff] }
 0x436   : > { %1710 = vrot.lane.b32.xlu2 %v1660_v37, %s2884_s11  ;;  %1708 = vrot.lane.b32.xlu1 %v1659_v34, %s2884_s11  ;;  %v1671_v34 = vmul.f32 %v1644_v59, %v1615_v43  ;;  %v433_v43 = vmul.f32 %v3761_v61, %v3186_v31 }
 0x437   : > { %1706 = vrot.lane.b32.xlu0 %v1658_v49, %s2884_s11  ;;  %v1614_v49 = vmul.f32 %v4030_v53, %v3262_v26 }
 0x439   : > { %v1670_v37 = vmul.f32 %v1644_v59, %v1614_v49  ;;  %v4891_v59 = vld [vmem:[#allocation88_spill] sm:$0xff] }
 0x43a   : > { %v1640_v23 = vpop.permute.xlu1 %1639  ;;  %v4902_v49 = vld [vmem:[#allocation24_spill] sm:$0xff] }
 0x43b   : > { %v1668_v4 = vmul.f32 %v1640_v23, %v1612_v18  ;;  %v1669_v27 = vmul.f32 %v1640_v23, %v4014_v32  ;;  %v1667_v62 = vmul.f32 %v1640_v23, %v1611_v60  ;;  %v4899_v23 = vld [vmem:[#allocation8_spill] sm:$0xff]  ;;  %v4900_v60 = vld [vmem:[#allocation51_spill] sm:$0xff] }
 0x43e   : > { %1716 = vrot.lane.b32.xlu2 %v1663_v50, %s2884_s11  ;;  %1714 = vrot.lane.b32.xlu1 %v1662_v10, %s2884_s11  ;;  %v4895_v10 = vld [vmem:[#allocation21_spill] sm:$0xff] }
 0x43f   : > { %1712 = vrot.lane.b32.xlu0 %v1661_v56, %s2884_s11  ;;  %v4109_v56 = vpop.permute.xlu0 %1647 }
 0x446   : > { %1722 = vrot.lane.b32.xlu2 %v1666_v28, %s2884_s11  ;;  %1720 = vrot.lane.b32.xlu1 %v1665_v25, %s2884_s11 }
 0x447   : > { %1718 = vrot.lane.b32.xlu0 %v1664_v19, %s2884_s11  ;;  %v4898_v19 = vld [vmem:[#allocation85_spill] sm:$0xff] }
 0x448   : > { %v500_v18 = vmul.f32 %v4899_v23, %v4898_v19 }
 0x44e   : > { %1728 = vrot.lane.b32.xlu2 %v1669_v27, %s2884_s11  ;;  %1726 = vrot.lane.b32.xlu1 %v1668_v4, %s2884_s11 }
 0x44f   : > { %1724 = vrot.lane.b32.xlu0 %v1667_v62, %s2884_s11 }
 0x456   : > { %2730 = vrot.lane.b32.xlu2 %v4890_v52, %s2887_s13  ;;  %1732 = vrot.lane.b32.xlu1 %v1671_v34, %s2884_s11  ;;  %v4903_v34 = vld [vmem:[#allocation23_spill] sm:$0xff] }
 0x457   : > { %1730 = vrot.lane.b32.xlu0 %v1670_v37, %s2884_s11  ;;  %v4904_v37 = vld [vmem:[#allocation93_spill] sm:$0xff] }
 0x45e   : > { %2058 = vperm.xlu2 %2736, %v3710_v24   ;;  %1828 = vperm.xlu1 %2735, %v3716_v58  }
 0x45f   : > { %1832 = vperm.xlu0 %2734, %v3710_v24   ;;  %v4894_v24 = vld [vmem:[#allocation87_spill] sm:$0xff] }
 0x466   : > { %2054 = vperm.xlu2 %2736, %v3716_v58   ;;  %1824 = vperm.xlu1 %2735, %v3697_v44  }
 0x467   : > { %1820 = vperm.xlu0 %2734, %v3704_v3  }
 0x46e   : > { %2046 = vperm.xlu2 %2736, %v3704_v3   ;;  %2737 = vset.pattern.permute.xlu1 %v2886_v21  ;;  %v4103_v3 = vpop.permute.xlu2 %1655 }
 0x46f   : > { %1848 = vperm.xlu0 %2734, %v4891_v59   ;;  %2050 = vperm.xlu1 %2737, %v3697_v44   ;;  %v427_v44 = vmul.f32 %v3761_v61, %v4889_v51 }
 0x471   : > { %v499_v58 = vmul.f32 %v3111_v46, %v427_v44  ;;  %v4901_v46 = vld [vmem:[#allocation70_spill] sm:$0xff]  ;;  %v4906_v44 = vld [vmem:[#allocation52_spill] sm:$0xff] }
 0x473   : > { %v716_v50 = vadd.f32 %v4895_v10, %v499_v58 }
 0x475   : > { %v944_v35 = vadd.f32 %v3361_v7, %v716_v50  ;;  %v904_v7 = vsel %vm901_vm9, %v4903_v34, %v4902_v49 }
 0x476   : > { %2074 = vperm.xlu2 %2736, %v4891_v59  }
 0x477   : > { %1840 = vperm.xlu0 %2734, %v4892_v47   ;;  %2738 = vset.pattern.permute.xlu1 %v2885_v36  ;;  %v1169_v4 = vadd.f32 %v4900_v60, %v944_v35  ;;  %v4907_v35 = vld [vmem:[#allocation36_spill] sm:$0xff] }
 0x478   : > { %1844 = vperm.xlu1 %2738, %v4893_v63  }
 0x479   : > { %v1321_v62 = vadd.f32 %v4901_v46, %v1169_v4 }
 0x47b   : > { %v1571_v52 = vadd.f32 %v4904_v37, %v1321_v62  ;;  %v4912_v62 = vld [vmem:[#allocation28_spill] sm:$0xff] }
 0x47c   : > { %v679_v49 = vsel %vm673_vm6, %v4907_v35, %v4912_v62 }
 0x47e   : > { %2740 = vset.pattern.permute.xlu2 %v2885_v36  ;;  %v4107_v36 = vpop.permute.xlu1 %1651 }
 0x47f   : > { %2741 = vset.pattern.permute.xlu0 %v2886_v21  ;;  %1836 = vperm.xlu2 %2740, %v4894_v24  }
 0x480   : > { %2066 = vperm.xlu0 %2741, %v4892_v47   ;;  %2739 = vset.pattern.permute.xlu1 %v2886_v21  ;;  %v4896_v21 = vld [vmem:[#allocation33_spill] sm:$0xff]  ;;  %v432_v47 = vmul.f32 %v3767_v16, %v3218_v5  ;;  %v4910_v16 = vld [vmem:[#allocation10_spill] sm:$0xff] }
 0x481   : > { %2070 = vperm.xlu1 %2739, %v4893_v63   ;;  %v676_v25 = vsel %vm673_vm6, %v4897_v13, %v4896_v21  ;;  %v4908_v21 = vld [vmem:[#allocation15_spill] sm:$0xff]  ;;  %v503_v4 = vmul.f32 %v4910_v16, %v4898_v19 }
 0x482   : > { %v717_v27 = vadd.f32 %v676_v25, %v500_v18  ;;  %v678_v13 = vsel %vm673_vm6, %v4908_v21, %v4907_v35  ;;  %v4909_v18 = vld [vmem:[#allocation89_spill] sm:$0xff]  ;;  %v504_v37 = vmul.f32 %v4910_v16, %v432_v47  ;;  %v4917_v35 = vld [vmem:[#allocation90_spill] sm:$0xff] }
 0x484   : > { %v945_v63 = vadd.f32 %v904_v7, %v717_v27  ;;  %v4911_v27 = vld [vmem:[#allocation94_spill] sm:$0xff] }
 0x489   : > { %2062 = vperm.xlu1 %2739, %v4894_v24   ;;  %v4905_v24 = vld [vmem:[#allocation54_spill] sm:$0xff] }
 0x48a   : > { %v1129_v58 = vsel %vm1126_vm10, %v4906_v44, %v4905_v24  ;;  %v4913_v24 = vld [vmem:[#allocation69_spill] sm:$0xff] }
 0x48b   : > { %v1170_v34 = vadd.f32 %v1129_v58, %v945_v63 }
 0x48d   : > { %v1322_v44 = vadd.f32 %v4913_v24, %v1170_v34  ;;  %v4920_v34 = vld [vmem:[#allocation53_spill] sm:$0xff] }
 0x48f   : > { %v1572_v63 = vadd.f32 %v4917_v35, %v1322_v44 }
 0x490   : > { %v1711_v28 = vpop.permute.xlu2 %1710 }
 0x498   : > { %v1717_v7 = vpop.permute.xlu2 %1716 }
 0x4a8   : > { %v1709_v59 = vpop.permute.xlu1 %1708 }
 0x4a9   : > { %v1756_v10 = vsel %vm1754_vm13, %v1709_v59, %v1711_v28  ;;  %v1707_v50 = vpop.permute.xlu0 %1706  ;;  %v505_v28 = vmul.f32 %v4910_v16, %v433_v43  ;;  %v4918_v16 = vld [vmem:[#allocation56_spill] sm:$0xff] }
 0x4aa   : > { %v4134_v25 = vadd.f32 %v1756_v10, %v1571_v52  ;;  %v1755_v23 = vsel %vm1754_vm13, %v1707_v50, %v1709_v59  ;;  %v4138_v60 = vadd.f32 %v1707_v50, %v4909_v18  ;;  %v720_v52 = vadd.f32 %v678_v13, %v503_v4  ;;  %v4914_v50 = vld [vmem:[#allocation37_spill] sm:$0xff]  ;;  %v4919_v4 = vld [vmem:[#allocation55_spill] sm:$0xff] }
 0x4ab   : > { %v4143_v46 = vadd.f32 %v1755_v23, %v4911_v27  ;;  %v722_v59 = vadd.f32 %v4912_v62, %v505_v28  ;;  %v721_v10 = vadd.f32 %v679_v49, %v504_v37  ;;  %v4915_v23 = vld [vmem:[#allocation30_spill] sm:$0xff]  ;;  %v4916_v18 = vld [vmem:[#allocation25_spill] sm:$0xff]  ;;  %v436_v27 = vmul.f32 %v3761_v61, %v3224_v9 }
 0x4ac   : > { %v906_v43 = vsel %vm901_vm9, %v4916_v18, %v4915_v23  ;;  %v907_v47 = vsel %vm901_vm9, %v4915_v23, %v4914_v50  ;;  %v1131_v28 = vsel %vm1126_vm10, %v4919_v4, %v4918_v16  ;;  %v1132_v37 = vsel %vm1126_vm10, %v4918_v16, %v4920_v34  ;;  %v4921_v61 = vld [vmem:[#allocation29_spill] sm:$0xff]  ;;  %v4923_v18 = vld [vmem:[#allocation7_spill] sm:$0xff] }
 0x4ad   : > { %v950_v21 = vadd.f32 %v4914_v50, %v722_v59  ;;  %v948_v13 = vadd.f32 %v906_v43, %v720_v52  ;;  %v949_v50 = vadd.f32 %v907_v47, %v721_v10  ;;  %v4922_v52 = vld [vmem:[#allocation43_spill] sm:$0xff]  ;;  %v508_v43 = vmul.f32 %v4923_v18, %v436_v27  ;;  %v1723_v10 = vpop.permute.xlu2 %1722 }
 0x4ae   : > { %v4924_v4 = vld [vmem:[#allocation71_spill] sm:$0xff] }
 0x4af   : > { %v1173_v35 = vadd.f32 %v1131_v28, %v948_v13  ;;  %v1289_v16 = vsel %vm420_vm7, %v4925_v45, %v4924_v4  ;;  %v1174_v57 = vadd.f32 %v1132_v37, %v949_v50 }
 0x4b0   : > { %v1715_v58 = vpop.permute.xlu1 %1714 }
 0x4b1   : > { %v1758_v62 = vsel %vm1754_vm13, %v1715_v58, %v1717_v7  ;;  %v1713_v49 = vpop.permute.xlu0 %1712  ;;  %v1175_v7 = vadd.f32 %v4920_v34, %v950_v21  ;;  %v1326_v47 = vadd.f32 %v1289_v16, %v1174_v57  ;;  %v4929_v21 = vld [vmem:[#allocation62_spill] sm:$0xff]  ;;  %v4932_v57 = vld [vmem:[#allocation16_spill] sm:$0xff]  ;;  %v509_v16 = vmul.f32 %v4854_v39, %v4898_v19 }
 0x4b2   : > { %v4170_v59 = vadd.f32 %v1758_v62, %v4921_v61  ;;  %v1757_v24 = vsel %vm1754_vm13, %v1713_v49, %v1715_v58  ;;  %v4173_v44 = vadd.f32 %v1713_v49, %v1572_v63  ;;  %v4926_v62 = vld [vmem:[#allocation31_spill] sm:$0xff]  ;;  %v1325_v63 = vadd.f32 %v4925_v45, %v1173_v35  ;;  %v4931_v45 = vld [vmem:[#allocation41_spill] sm:$0xff] }
 0x4b3   : > { %v4176_v23 = vadd.f32 %v1757_v24, %v4922_v52  ;;  %v725_v61 = vadd.f32 %v4926_v62, %v508_v43  ;;  %v1327_v58 = vadd.f32 %v4924_v4, %v1175_v7  ;;  %v4927_v49 = vld [vmem:[#allocation91_spill] sm:$0xff]  ;;  %v4928_v52 = vld [vmem:[#allocation32_spill] sm:$0xff]  ;;  %v1576_v13 = vadd.f32 %v4929_v21, %v1326_v47  ;;  %v4933_v62 = vld [vmem:[#allocation57_spill] sm:$0xff] }
 0x4b4   : > { %v1575_v24 = vadd.f32 %v4927_v49, %v1325_v63  ;;  %v682_v35 = vsel %vm673_vm6, %v4932_v57, %v4931_v45 }
 0x4b5   : > { %v1577_v27 = vadd.f32 %v4928_v52, %v1327_v58  ;;  %v953_v37 = vadd.f32 %v4930_v14, %v725_v61  ;;  %v726_v63 = vadd.f32 %v682_v35, %v509_v16  ;;  %v1729_v47 = vpop.permute.xlu2 %1728 }
 0x4b7   : > { %v1178_v58 = vadd.f32 %v4933_v62, %v953_v37  ;;  %v4938_v37 = vld [vmem:[#allocation11_spill] sm:$0xff] }
 0x4b8   : > { %v1721_v18 = vpop.permute.xlu1 %1720 }
 0x4b9   : > { %v1760_v28 = vsel %vm1754_vm13, %v1721_v18, %v1723_v10  ;;  %v1719_v34 = vpop.permute.xlu0 %1718  ;;  %v4934_v10 = vld [vmem:[#allocation74_spill] sm:$0xff] }
 0x4ba   : > { %v4191_v50 = vadd.f32 %v1760_v28, %v1577_v27  ;;  %v1759_v43 = vsel %vm1754_vm13, %v1719_v34, %v1721_v18  ;;  %v4194_v7 = vadd.f32 %v1719_v34, %v1575_v24  ;;  %v1330_v14 = vadd.f32 %v4934_v10, %v1178_v58  ;;  %v4935_v24 = vld [vmem:[#allocation27_spill] sm:$0xff]  ;;  %v4937_v34 = vld [vmem:[#allocation92_spill] sm:$0xff] }
 0x4bb   : > { %v4199_v4 = vadd.f32 %v1759_v43, %v1576_v13  ;;  %v910_v52 = vsel %vm901_vm9, %v4935_v24, %v4865_v42  ;;  %v4936_v27 = vld [vmem:[#allocation59_spill] sm:$0xff]  ;;  %v4939_v42 = vld [vmem:[#allocation73_spill] sm:$0xff] }
 0x4bc   : > { %v1580_v61 = vadd.f32 %v3922_v55, %v1330_v14  ;;  %v1135_v18 = vsel %vm1126_vm10, %v4936_v27, %v4867_v54  ;;  %v954_v19 = vadd.f32 %v910_v52, %v726_v63 }
 0x4bd   : > { %v2731_v10 = vpop.permute.xlu2 %2730 }
 0x4be   : > { %v1179_v45 = vadd.f32 %v1135_v18, %v954_v19  ;;  %v4236_v24 = vunpack.i.l.bf16 %v2731_v10  ;;  %v2733_v27 = vunpack.i.h.bf16 %v2731_v10 }
 0x4c0   : > { %v1727_v49 = vpop.permute.xlu1 %1726  ;;  %v1331_v57 = vadd.f32 %v4939_v42, %v1179_v45  ;;  %v2030_v52 = vmul.f32 %v4236_v24, %v3240_v33  ;;  %v4249_v19 = vsel %vm2016_vm14, %v4236_v24, %v2733_v27  ;;  %v4257_v42 = vmul.f32 0.0, %v2733_v27 }
 0x4c1   : > { %v1762_v21 = vsel %vm1754_vm13, %v1727_v49, %v1729_v47  ;;  %v1725_v39 = vpop.permute.xlu0 %1724 }
 0x4c2   : > { %v4213_v13 = vadd.f32 %v1762_v21, %v1580_v61  ;;  %v1761_v28 = vsel %vm1754_vm13, %v1725_v39, %v1727_v49  ;;  %v4217_v55 = vadd.f32 %v1725_v39, %v4937_v34  ;;  %v1581_v35 = vadd.f32 %v3834_v2, %v1331_v57 }
 0x4c3   : > { %v4220_v43 = vadd.f32 %v1761_v28, %v4938_v37 }
 0x4c8   : > { %v4224_v54 = vpop.permute.xlu1 %1732 }
 0x4c9   : > { %v1731_v16 = vpop.permute.xlu0 %1730 }
 0x4ca   : > { %v1763_v62 = vsel %vm1754_vm13, %v1731_v16, %v4224_v54  ;;  %v4228_v58 = vadd.f32 %v1731_v16, %v1581_v35  ;;  %v2027_v35 = vmul.f32 %v4236_v24, %v3218_v5 }
 0x4cb   : > { %v4231_v63 = vadd.f32 %v1763_v62, %v3955_v48  ;;  %v2059_v48 = vpop.permute.xlu2 %2058 }
 0x4cc   : > { %v2086_v18 = vmul.f32 %v2059_v48, %v2030_v52  ;;  %v2088_v62 = vmul.f32 %v2059_v48, %v4257_v42 }
 0x4d0   : > { %v1829_v14 = vpop.permute.xlu1 %1828 }
 0x4d1   : > { %v1857_v61 = vmul.f32 %v1829_v14, %v3218_v5  ;;  %v1833_v47 = vpop.permute.xlu0 %1832  ;;  %v1858_v21 = vmul.f32 %v1829_v14, %v3186_v31  ;;  %v1859_v45 = vmul.f32 0.0, %v1829_v14  ;;  %v2028_v14 = vmul.f32 %v4249_v19, %v3186_v31 }
 0x4d2   : > { %v1860_v49 = vmul.f32 %v1833_v47, %v3240_v33  ;;  %v1861_v2 = vmul.f32 %v1833_v47, %v3224_v9  ;;  %v1862_v39 = vmul.f32 0.0, %v1833_v47  ;;  %v2031_v33 = vmul.f32 %v4249_v19, %v3224_v9 }
 0x4d3   : > { %1911 = vrot.lane.b32.xlu0 %v1857_v61, %s2888_s14  ;;  %v2055_v57 = vpop.permute.xlu2 %2054 }
 0x4d4   : > { %1919 = vrot.lane.b32.xlu1 %v1861_v2, %s2888_s14  ;;  %1917 = vrot.lane.b32.xlu2 %v1860_v49, %s2888_s14  ;;  %v2087_v37 = vmul.f32 %v2059_v48, %v2031_v33  ;;  %v2083_v16 = vmul.f32 %v2055_v57, %v2027_v35  ;;  %v2084_v47 = vmul.f32 %v2055_v57, %v2028_v14 }
 0x4d5   : > { %v2024_v2 = vmul.f32 %v4236_v24, %v3167_v15  ;;  %v2085_v52 = vmul.f32 %v2055_v57, %v4257_v42  ;;  %v1623_v33 = vmul.f32 %v4030_v53, %v3295_v6  ;;  %v1624_v57 = vmul.f32 %v4040_v41, %v3177_v22 }
 0x4d6   : > { %v1681_v14 = vmul.f32 %v4103_v3, %v4014_v32 }
 0x4d8   : > { %v1825_v28 = vpop.permute.xlu1 %1824 }
 0x4d9   : > { %v1854_v34 = vmul.f32 %v1825_v28, %v3167_v15  ;;  %v1855_v9 = vmul.f32 %v1825_v28, %v3163_v12  ;;  %v1821_v10 = vpop.permute.xlu0 %1820  ;;  %v1856_v49 = vmul.f32 0.0, %v1825_v28 }
 0x4da   : > { %v1851_v61 = vmul.f32 %v1821_v10, %v3143_v1  ;;  %v1852_v27 = vmul.f32 %v1821_v10, %v4889_v51  ;;  %v1853_v15 = vmul.f32 0.0, %v1821_v10 }
 0x4db   : > { %2143 = vrot.lane.b32.xlu0 %v2086_v18, %s2889_s20  ;;  %v2047_v31 = vpop.permute.xlu2 %2046  ;;  %v2021_v18 = vmul.f32 %v4236_v24, %v3143_v1  ;;  %v1679_v1 = vmul.f32 %v4103_v3, %v1623_v33 }
 0x4dc   : > { %1913 = vrot.lane.b32.xlu1 %v1858_v21, %s2888_s14  ;;  %1921 = vrot.lane.b32.xlu2 %v1862_v39, %s2888_s14  ;;  %v2025_v21 = vmul.f32 %v4249_v19, %v3163_v12 }
 0x4dd   : > { %v2077_v39 = vmul.f32 %v2047_v31, %v2021_v18 }
 0x4e1   : > { %v2051_v5 = vpop.permute.xlu1 %2050 }
 0x4e2   : > { %v2080_v48 = vmul.f32 %v2051_v5, %v2024_v2  ;;  %v2081_v28 = vmul.f32 %v2051_v5, %v2025_v21  ;;  %v2082_v12 = vmul.f32 %v2051_v5, %v4257_v42 }
 0x4e3   : > { %1905 = vrot.lane.b32.xlu0 %v1854_v34, %s2888_s14  ;;  %v2022_v34 = vmul.f32 %v4249_v19, %v4889_v51  ;;  %v1680_v51 = vmul.f32 %v4103_v3, %v1624_v57 }
 0x4e4   : > { %2145 = vrot.lane.b32.xlu1 %v2087_v37, %s2889_s20  ;;  %1915 = vrot.lane.b32.xlu2 %v1859_v45, %s2888_s14  ;;  %v1620_v45 = vmul.f32 %v4030_v53, %v3273_v17 }
 0x4e5   : > { %v2078_v37 = vmul.f32 %v2047_v31, %v2022_v34 }
 0x4e6   : > { %v1676_v35 = vmul.f32 %v4107_v36, %v1620_v45 }
 0x4eb   : > { %2137 = vrot.lane.b32.xlu0 %v2083_v16, %s2889_s20  ;;  %v2079_v16 = vmul.f32 %v2047_v31, %v4257_v42  ;;  %v4941_v31 = vld [vmem:[#allocation19_spill] sm:$0xff] }
 0x4ec   : > { %1907 = vrot.lane.b32.xlu1 %v1855_v9, %s2888_s14  ;;  %2147 = vrot.lane.b32.xlu2 %v2088_v62, %s2889_s20  ;;  %v1849_v62 = vpop.permute.xlu0 %1848  ;;  %v1621_v9 = vmul.f32 %v4040_v41, %v3154_v8  ;;  %v1618_v18 = vmul.f32 %v4040_v41, %v4941_v31  ;;  %v1675_v41 = vmul.f32 %v4109_v56, %v4014_v32 }
 0x4ed   : > { %v1872_v10 = vmul.f32 %v1849_v62, %v3295_v6 }
 0x4ee   : > { %v1674_v21 = vmul.f32 %v4109_v56, %v1618_v18 }
 0x4f3   : > { %1899 = vrot.lane.b32.xlu0 %v1851_v61, %s2888_s14  ;;  %v1677_v61 = vmul.f32 %v4107_v36, %v1621_v9 }
 0x4f4   : > { %2139 = vrot.lane.b32.xlu1 %v2084_v47, %s2889_s20  ;;  %1909 = vrot.lane.b32.xlu2 %v1856_v49, %s2888_s14  ;;  %v2075_v47 = vpop.permute.xlu2 %2074  ;;  %v4940_v49 = vld [vmem:[#allocation20_spill] sm:$0xff] }
 0x4f5   : > { %v1617_v5 = vmul.f32 %v4030_v53, %v4940_v49 }
 0x4f7   : > { %v1673_v2 = vmul.f32 %v4109_v56, %v1617_v5 }
 0x4fb   : > { %2131 = vrot.lane.b32.xlu0 %v2080_v48, %s2889_s20  ;;  %v1678_v48 = vmul.f32 %v4107_v36, %v4014_v32 }
 0x4fc   : > { %2141 = vrot.lane.b32.xlu2 %v2085_v52, %s2889_s20  ;;  %1901 = vrot.lane.b32.xlu1 %v1852_v27, %s2888_s14  ;;  %v1873_v52 = vmul.f32 %v1849_v62, %v3177_v22  ;;  %v4323_v3 = vpop.permute.xlu2 %1836  ;;  %v1845_v27 = vpop.permute.xlu1 %1844 }
 0x4fd   : > { %v1869_v53 = vmul.f32 %v1845_v27, %v3273_v17  ;;  %v1870_v34 = vmul.f32 %v1845_v27, %v3154_v8 }
 0x503   : > { %2125 = vrot.lane.b32.xlu0 %v2077_v39, %s2889_s20  ;;  %v1874_v39 = vmul.f32 0.0, %v1849_v62 }
 0x504   : > { %2133 = vrot.lane.b32.xlu1 %v2081_v28, %s2889_s20  ;;  %1903 = vrot.lane.b32.xlu2 %v1853_v15, %s2888_s14  ;;  %v2042_v15 = vmul.f32 %v4236_v24, %v3295_v6  ;;  %v2043_v6 = vmul.f32 %v4249_v19, %v3177_v22 }
 0x506   : > { %v2098_v33 = vmul.f32 %v2075_v47, %v2042_v15  ;;  %v2099_v45 = vmul.f32 %v2075_v47, %v2043_v6  ;;  %v1863_v15 = vmul.f32 %v4323_v3, %v3262_v26 }
 0x50b   : > { %1748 = vrot.lane.b32.xlu0 %v1679_v1, %s2884_s11  ;;  %v1841_v1 = vpop.permute.xlu0 %1840 }
 0x50c   : > { %2127 = vrot.lane.b32.xlu1 %v2078_v37, %s2889_s20  ;;  %2135 = vrot.lane.b32.xlu2 %v2082_v12, %s2889_s20  ;;  %v2071_v37 = vpop.permute.xlu1 %2070 }
 0x513   : > { %1742 = vrot.lane.b32.xlu0 %v1676_v35, %s2884_s11  ;;  %v4347_v32 = vpop.permute.xlu0 %2066  ;;  %v1868_v35 = vmul.f32 0.0, %v1841_v1 }
 0x514   : > { %1750 = vrot.lane.b32.xlu1 %v1680_v51, %s2884_s11  ;;  %2129 = vrot.lane.b32.xlu2 %v2079_v16, %s2889_s20  ;;  %v4349_v56 = vpop.permute.xlu1 %2062  ;;  %v2100_v51 = vmul.f32 %v2075_v47, %v4257_v42  ;;  %v1866_v16 = vmul.f32 %v1841_v1, %v4940_v49  ;;  %v2094_v6 = vmul.f32 %v4347_v32, %v4257_v42 }
 0x51b   : > { %1941 = vrot.lane.b32.xlu0 %v1872_v10, %s2888_s14 }
 0x51c   : > { %1744 = vrot.lane.b32.xlu1 %v1677_v61, %s2884_s11  ;;  %1752 = vrot.lane.b32.xlu2 %v1681_v14, %s2884_s11  ;;  %v2039_v61 = vmul.f32 %v4236_v24, %v3273_v17 }
 0x523   : > { %1736 = vrot.lane.b32.xlu0 %v1673_v2, %s2884_s11  ;;  %v2097_v2 = vmul.f32 %v2071_v37, %v4257_v42 }
 0x524   : > { %1746 = vrot.lane.b32.xlu2 %v1678_v48, %s2884_s11  ;;  %1943 = vrot.lane.b32.xlu1 %v1873_v52, %s2888_s14  ;;  %v1867_v48 = vmul.f32 %v1841_v1, %v4941_v31  ;;  %v2095_v52 = vmul.f32 %v2071_v37, %v2039_v61  ;;  %v2036_v1 = vmul.f32 %v4236_v24, %v4940_v49 }
 0x52b   : > { %1935 = vrot.lane.b32.xlu0 %v1869_v53, %s2888_s14 }
 0x52c   : > { %1738 = vrot.lane.b32.xlu1 %v1674_v21, %s2884_s11  ;;  %1945 = vrot.lane.b32.xlu2 %v1874_v39, %s2888_s14 }
 0x52e   : > { %v1918_v36 = vpop.permute.xlu2 %1917 }
 0x52f   : > { %v1997_v28 = vadd.f32 %v1918_v36, %v4217_v55  ;;  %v1871_v55 = vmul.f32 0.0, %v1845_v27 }
 0x533   : > { %2167 = vrot.lane.b32.xlu0 %v2098_v33, %s2889_s20 }
 0x534   : > { %1937 = vrot.lane.b32.xlu1 %v1870_v34, %s2888_s14  ;;  %1740 = vrot.lane.b32.xlu2 %v1675_v41, %s2884_s11 }
 0x536   : > { %v1922_v12 = vpop.permute.xlu2 %1921 }
 0x53b   : > { %1734 = vrot.lane.b32.xlu0 %v4026_v20, %s2884_s11 }
 0x53c   : > { %2169 = vrot.lane.b32.xlu1 %v2099_v45, %s2889_s20  ;;  %1939 = vrot.lane.b32.xlu2 %v1871_v55, %s2888_s14  ;;  %v1864_v45 = vmul.f32 %v4323_v3, %v3233_v30  ;;  %v2092_v55 = vmul.f32 %v4347_v32, %v2036_v1 }
 0x53e   : > { %v1916_v57 = vpop.permute.xlu2 %1915 }
 0x543   : > { %1933 = vrot.lane.b32.xlu0 %v1868_v35, %s2888_s14 }
 0x544   : > { %2171 = vrot.lane.b32.xlu2 %v2100_v51, %s2889_s20  ;;  %1929 = vrot.lane.b32.xlu1 %v1866_v16, %s2888_s14 }
 0x545   : > { %v1912_v22 = vpop.permute.xlu0 %1911 }
 0x546   : > { %v1920_v20 = vpop.permute.xlu1 %1919  ;;  %v2148_v62 = vpop.permute.xlu2 %2147  ;;  %v1994_v9 = vadd.f32 %v1912_v22, %v4194_v7 }
 0x547   : > { %v1954_v10 = vsel %vm1947_vm15, %v1918_v36, %v1920_v20  ;;  %v1955_v14 = vsel %vm1947_vm15, %v1920_v20, %v1922_v12  ;;  %v1865_v36 = vmul.f32 0.0, %v4323_v3  ;;  %v2037_v3 = vmul.f32 %v4249_v19, %v4941_v31 }
 0x548   : > { %v1998_v47 = vadd.f32 %v1954_v10, %v4220_v43  ;;  %v1999_v5 = vadd.f32 %v1955_v14, %v4213_v13  ;;  %v2040_v43 = vmul.f32 %v4249_v19, %v3154_v8  ;;  %v2091_v10 = vmul.f32 %v4349_v56, %v4257_v42 }
 0x549   : > { %v2034_v42 = vmul.f32 %v4249_v19, %v3233_v30 }
 0x54a   : > { %v2096_v33 = vmul.f32 %v2071_v37, %v2040_v43 }
 0x54b   : > { %2165 = vrot.lane.b32.xlu0 %v2097_v2, %s2889_s20 }
 0x54c   : > { %1931 = vrot.lane.b32.xlu2 %v1867_v48, %s2888_s14  ;;  %2161 = vrot.lane.b32.xlu1 %v2095_v52, %s2889_s20 }
 0x54d   : > { %v2144_v7 = vpop.permute.xlu0 %2143 }
 0x54e   : > { %v1914_v27 = vpop.permute.xlu1 %1913  ;;  %v1910_v18 = vpop.permute.xlu2 %1909  ;;  %v4368_v53 = vadd.f32 %v2144_v7, %v1997_v28 }
 0x54f   : > { %v1952_v17 = vsel %vm1947_vm15, %v1912_v22, %v1914_v27  ;;  %v1953_v13 = vsel %vm1947_vm15, %v1914_v27, %v1916_v57  ;;  %v2033_v22 = vmul.f32 %v4236_v24, %v3262_v26 }
 0x550   : > { %v1995_v21 = vadd.f32 %v1952_v17, %v4199_v4  ;;  %v1996_v39 = vadd.f32 %v1953_v13, %v4191_v50 }
 0x551   : > { %v2089_v14 = vmul.f32 %v4349_v56, %v2033_v22 }
 0x553   : > { %1927 = vrot.lane.b32.xlu0 %v1865_v36, %s2888_s14 }
 0x554   : > { %2163 = vrot.lane.b32.xlu2 %v2096_v33, %s2889_s20  ;;  %1923 = vrot.lane.b32.xlu1 %v1863_v15, %s2888_s14 }
 0x555   : > { %v1906_v28 = vpop.permute.xlu0 %1905 }
 0x556   : > { %v2146_v41 = vpop.permute.xlu1 %2145  ;;  %v2142_v8 = vpop.permute.xlu2 %2141  ;;  %v1991_v4 = vadd.f32 %v1906_v28, %v4173_v44 }
 0x557   : > { %v2180_v50 = vsel %vm2173_vm0, %v2144_v7, %v2146_v41  ;;  %v2181_v34 = vsel %vm2173_vm0, %v2146_v41, %v2148_v62 }
 0x558   : > { %v4387_v37 = vadd.f32 %v2180_v50, %v1998_v47  ;;  %v4389_v12 = vadd.f32 %v2181_v34, %v1999_v5  ;;  %v2090_v5 = vmul.f32 %v4349_v56, %v2034_v42 }
 0x55b   : > { %2159 = vrot.lane.b32.xlu0 %v2094_v6, %s2889_s20 }
 0x55c   : > { %1925 = vrot.lane.b32.xlu2 %v1864_v45, %s2888_s14  ;;  %2155 = vrot.lane.b32.xlu1 %v2092_v55, %s2889_s20  ;;  %v2261_v45 = vmul.f32 0.044715, %v4389_v12  ;;  %s2505_s14 = sshll.u32 %s190_s9, 4  ;;  %s2506_s14 = int_to_ptr.vmem [resolvable:$true] %s2505_s14 }
 0x55d   : > { %v2138_v44 = vpop.permute.xlu0 %2137 }
 0x55e   : > { %v1908_v49 = vpop.permute.xlu1 %1907  ;;  %v1904_v57 = vpop.permute.xlu2 %1903  ;;  %v4399_v35 = vadd.f32 %v2138_v44, %v1994_v9  ;;  %v2093_v9 = vmul.f32 %v4347_v32, %v2037_v3 }
 0x55f   : > { %v1950_v51 = vsel %vm1947_vm15, %v1906_v28, %v1908_v49  ;;  %v1951_v16 = vsel %vm1947_vm15, %v1908_v49, %v1910_v18  ;;  %v2260_v49 = vmul.f32 0.044715, %v4387_v37 }
 0x560   : > { %v1992_v20 = vadd.f32 %v1950_v51, %v4176_v23  ;;  %v1993_v62 = vadd.f32 %v1951_v16, %v4170_v59  ;;  %v2273_v16 = vmul.f32 %v2261_v45, %v4389_v12 }
 0x561   : > { %v2272_v22 = vmul.f32 %v2260_v49, %v4387_v37 }
 0x563   : > { %2153 = vrot.lane.b32.xlu0 %v2091_v10, %s2889_s20  ;;  %v2285_v10 = vmul.f32 %v2273_v16, %v4389_v12 }
 0x564   : > { %2157 = vrot.lane.b32.xlu2 %v2093_v9, %s2889_s20  ;;  %2149 = vrot.lane.b32.xlu1 %v2089_v14, %s2889_s20  ;;  %v2284_v14 = vmul.f32 %v2272_v22, %v4387_v37 }
 0x565   : > { %v1900_v31 = vpop.permute.xlu0 %1899 }
 0x566   : > { %v2140_v61 = vpop.permute.xlu1 %2139  ;;  %v2136_v26 = vpop.permute.xlu2 %2135  ;;  %v1988_v23 = vadd.f32 %v1900_v31, %v4138_v60 }
 0x567   : > { %v2178_v59 = vsel %vm2173_vm0, %v2138_v44, %v2140_v61  ;;  %v2179_v24 = vsel %vm2173_vm0, %v2140_v61, %v2142_v8 }
 0x568   : > { %v4421_v32 = vadd.f32 %v2178_v59, %v1995_v21  ;;  %v4423_v47 = vadd.f32 %v2179_v24, %v1996_v39 }
 0x56a   : > { %v2258_v59 = vmul.f32 0.044715, %v4423_v47 }
 0x56c   : > { %2151 = vrot.lane.b32.xlu2 %v2090_v5, %s2889_s20 }
 0x56d   : > { %v2132_v2 = vpop.permute.xlu0 %2131 }
 0x56e   : > { %v1902_v48 = vpop.permute.xlu1 %1901  ;;  %v2130_v52 = vpop.permute.xlu2 %2129  ;;  %v4427_v7 = vadd.f32 %v2132_v2, %v1991_v4  ;;  %v2259_v4 = vmul.f32 0.044715, %v4368_v53 }
 0x56f   : > { %v1948_v60 = vsel %vm1947_vm15, %v1900_v31, %v1902_v48  ;;  %v1949_v27 = vsel %vm1947_vm15, %v1902_v48, %v1904_v57  ;;  %v2256_v31 = vmul.f32 0.044715, %v4399_v35 }
 0x570   : > { %v1989_v18 = vadd.f32 %v1948_v60, %v4143_v46  ;;  %v1990_v30 = vadd.f32 %v1949_v27, %v4134_v25  ;;  %v2271_v6 = vmul.f32 %v2259_v4, %v4368_v53  ;;  %v2257_v60 = vmul.f32 0.044715, %v4421_v32 }
 0x571   : > { %v2268_v24 = vmul.f32 %v2256_v31, %v4399_v35  ;;  %v2270_v27 = vmul.f32 %v2258_v59, %v4423_v47 }
 0x572   : > { %v2283_v44 = vmul.f32 %v2271_v6, %v4368_v53 }
 0x574   : > { %v2295_v3 = vadd.f32 %v2283_v44, %v4368_v53 }
 0x575   : > { %v2126_v19 = vpop.permute.xlu0 %2125 }
 0x576   : > { %v2134_v17 = vpop.permute.xlu1 %2133  ;;  %v4433_v13 = vpop.permute.xlu2 %1752  ;;  %v4435_v56 = vadd.f32 %v2126_v19, %v1988_v23  ;;  %v2296_v23 = vadd.f32 %v2284_v14, %v4387_v37  ;;  %v2249_v14 = vmul.f32 0.5, %v4389_v12 }
 0x577   : > { %v2176_v43 = vsel %vm2173_vm0, %v2132_v2, %v2134_v17  ;;  %v2177_v21 = vsel %vm2173_vm0, %v2134_v17, %v2136_v26  ;;  %v2297_v26 = vadd.f32 %v2285_v10, %v4389_v12  ;;  %v2269_v17 = vmul.f32 %v2257_v60, %v4421_v32 }
 0x578   : > { %v4439_v39 = vadd.f32 %v2176_v43, %v1992_v20  ;;  %v4441_v36 = vadd.f32 %v2177_v21, %v1993_v62  ;;  %v2307_v62 = vmul.f32 0.7978846, %v2295_v3  ;;  %v2308_v48 = vmul.f32 0.7978846, %v2296_v23 }
 0x579   : > { %v2309_v5 = vmul.f32 0.7978846, %v2297_v26  ;;  %v2248_v12 = vmul.f32 0.5, %v4387_v37 }
 0x57a   : > { %2772 = vtanh.f32 %v2307_v62 }
 0x57b   : > { %2774 = vtanh.f32 %v2309_v5  ;;  %v2253_v5 = vmul.f32 0.044715, %v4427_v7 }
 0x57c   : > { %2776 = vtanh.f32 %v2308_v48 }
 0x57d   : > { %v1749_v15 = vpop.permute.xlu0 %1748 }
 0x57e   : > { %v2128_v33 = vpop.permute.xlu1 %2127  ;;  %v4443_v28 = vpop.permute.xlu2 %1746 }
 0x57f   : > { %v2174_v25 = vsel %vm2173_vm0, %v2126_v19, %v2128_v33  ;;  %v2175_v46 = vsel %vm2173_vm0, %v2128_v33, %v2130_v52  ;;  %v2247_v33 = vmul.f32 0.5, %v4368_v53 }
 0x580   : > { %v4447_v41 = vadd.f32 %v2174_v25, %v1989_v18  ;;  %v4449_v8 = vadd.f32 %v2175_v46, %v1990_v30  ;;  %v2773_v52 = vpop.eup %2772  ;;  %v2280_v18 = vmul.f32 %v2268_v24, %v4399_v35  ;;  %v1816_v30 = vadd.f32 %v1749_v15, %v3948_v38 }
 0x581   : > { %v2331_v19 = vadd.f32 1.0, %v2773_v52  ;;  %v2282_v25 = vmul.f32 %v2270_v27, %v4423_v47  ;;  %v2775_v49 = vpop.eup %2774  ;;  %v2281_v38 = vmul.f32 %v2269_v17, %v4421_v32  ;;  %v2265_v17 = vmul.f32 %v2253_v5, %v4427_v7 }
 0x582   : > { %v2292_v4 = vadd.f32 %v2280_v18, %v4399_v35  ;;  %v2777_v16 = vpop.eup %2776  ;;  %v2333_v31 = vadd.f32 1.0, %v2775_v49 }
 0x583   : > { %v2343_v45 = vmul.f32 %v2331_v19, %v2247_v33  ;;  %v2294_v22 = vadd.f32 %v2282_v25, %v4423_v47  ;;  %v2332_v59 = vadd.f32 1.0, %v2777_v16  ;;  %v2293_v24 = vadd.f32 %v2281_v38, %v4421_v32 }
 0x584   : > { %v2304_v10 = vmul.f32 0.7978846, %v2292_v4  ;;  %v2345_v27 = vmul.f32 %v2333_v31, %v2249_v14  ;;  %v2251_v31 = vmul.f32 0.044715, %v4447_v41 }
 0x585   : > { %v4452_v50 = vpop.permute.xlu0 %1742  ;;  %v2306_v52 = vmul.f32 0.7978846, %v2294_v22  ;;  %v2305_v19 = vmul.f32 0.7978846, %v2293_v24  ;;  %v2245_v24 = vmul.f32 0.5, %v4421_v32 }
 0x586   : > { %v1751_v34 = vpop.permute.xlu1 %1750  ;;  %v1946_v1 = vpop.permute.xlu2 %1945  ;;  %2778 = vtanh.f32 %v2304_v10 }
 0x587   : > { %v1769_v62 = vsel %vm1754_vm13, %v1749_v15, %v1751_v34  ;;  %v1770_v53 = vsel %vm1754_vm13, %v1751_v34, %v4433_v13  ;;  %v2255_v13 = vmul.f32 0.044715, %v4441_v36  ;;  %2780 = vtanh.f32 %v2306_v52 }
 0x588   : > { %v1817_v48 = vadd.f32 %v1769_v62, %v4035_v0  ;;  %v1818_v15 = vadd.f32 %v1770_v53, %v4037_v40  ;;  %2782 = vtanh.f32 %v2305_v19  ;;  %v2252_v62 = vmul.f32 0.044715, %v4449_v8 }
 0x589   : > { %v2267_v37 = vmul.f32 %v2255_v13, %v4441_v36  ;;  %v2246_v52 = vmul.f32 0.5, %v4423_v47 }
 0x58b   : > { %v2279_v16 = vmul.f32 %v2267_v37, %v4441_v36 }
 0x58d   : > { %v1942_v55 = vpop.permute.xlu0 %1941 }
 0x58e   : > { %v4458_v57 = vpop.permute.xlu1 %1744  ;;  %v4460_v51 = vpop.permute.xlu2 %1740  ;;  %v2009_v21 = vadd.f32 %v1942_v55, %v1816_v30  ;;  %v2344_v30 = vmul.f32 %v2332_v59, %v2248_v12  ;;  %v2264_v12 = vmul.f32 %v2252_v62, %v4449_v8 }
 0x58f   : > { %v1768_v59 = vsel %vm1754_vm13, %v4458_v57, %v4443_v28 }
 0x595   : > { %v4465_v20 = vpop.permute.xlu0 %1736 }
 0x596   : > { %v1944_v9 = vpop.permute.xlu1 %1943  ;;  %v4470_v61 = vpop.permute.xlu2 %1939 }
 0x597   : > { %v1962_v26 = vsel %vm1947_vm15, %v1942_v55, %v1944_v9  ;;  %v1963_v23 = vsel %vm1947_vm15, %v1944_v9, %v1946_v1  ;;  %v2254_v1 = vmul.f32 0.044715, %v4439_v39 }
 0x598   : > { %v2010_v55 = vadd.f32 %v1962_v26, %v1817_v48  ;;  %v2011_v9 = vadd.f32 %v1963_v23, %v1818_v15  ;;  %v1767_v15 = vsel %vm1754_vm13, %v4452_v50, %v4458_v57  ;;  %v1815_v57 = vadd.f32 %v1768_v59, %v4018_v11 }
 0x599   : > { %v2266_v25 = vmul.f32 %v2254_v1, %v4439_v39 }
 0x59b   : > { %v2278_v14 = vmul.f32 %v2266_v25, %v4439_v39 }
 0x59d   : > { %v4476_v42 = vpop.permute.xlu0 %1935  ;;  %v2290_v32 = vadd.f32 %v2278_v14, %v4439_v39 }
 0x59e   : > { %v4478_v2 = vpop.permute.xlu1 %1738  ;;  %v2172_v43 = vpop.permute.xlu2 %2171 }
 0x59f   : > { %v2302_v25 = vmul.f32 0.7978846, %v2290_v32  ;;  %v4943_v32 = vld [vmem:[#allocation63_spill] sm:$0xff] }
 0x5a5   : > { %v2168_v46 = vpop.permute.xlu0 %2167 }
 0x5a6   : > { %v4488_v6 = vpop.permute.xlu1 %1937  ;;  %v2235_v44 = vadd.f32 %v2168_v46, %v2009_v21  ;;  %v4503_v34 = vpop.permute.xlu2 %1931 }
 0x5a7   : > { %v1961_v28 = vsel %vm1947_vm15, %v4488_v6, %v4470_v61  ;;  %v1960_v47 = vsel %vm1947_vm15, %v4476_v42, %v4488_v6 }
 0x5a8   : > { %v2355_v3 = vmul.f32 %v2343_v45, %v2235_v44  ;;  %v2779_v44 = vpop.eup %2778  ;;  %v2008_v19 = vadd.f32 %v1961_v28, %v1815_v57 }
 0x5a9   : > { %v2781_v22 = vpop.eup %2780  ;;  %v2328_v10 = vadd.f32 1.0, %v2779_v44 }
 0x5aa   : > { %v2783_v48 = vpop.eup %2782  ;;  %v2330_v13 = vadd.f32 1.0, %v2781_v22 }
 0x5ad   : > { %v4506_v60 = vpop.permute.xlu0 %1734 }
 0x5ae   : > { %v2170_v18 = vpop.permute.xlu1 %2169  ;;  %v2164_v26 = vpop.permute.xlu2 %2163 }
 0x5af   : > { %v2188_v0 = vsel %vm2173_vm0, %v2168_v46, %v2170_v18  ;;  %v2189_v40 = vsel %vm2173_vm0, %v2170_v18, %v2172_v43  ;;  %v2250_v46 = vmul.f32 0.044715, %v4435_v56  ;;  %v2277_v43 = vmul.f32 %v2265_v17, %v4427_v7 }
 0x5b0   : > { %v2236_v21 = vadd.f32 %v2188_v0, %v2010_v55  ;;  %v2237_v33 = vadd.f32 %v2189_v40, %v2011_v9  ;;  %v2263_v55 = vmul.f32 %v2251_v31, %v4447_v41  ;;  %v4942_v9 = vld [vmem:[#allocation17_spill] sm:$0xff]  ;;  %v1814_v18 = vadd.f32 %v1767_v15, %v4016_v29 }
 0x5b1   : > { %v2262_v23 = vmul.f32 %v2250_v46, %v4435_v56  ;;  %v2289_v5 = vadd.f32 %v2277_v43, %v4427_v7  ;;  %v2329_v0 = vadd.f32 1.0, %v2783_v48  ;;  %v2342_v17 = vmul.f32 %v2330_v13, %v2246_v52 }
 0x5b2   : > { %v2356_v4 = vmul.f32 %v2344_v30, %v2236_v21  ;;  %v4514_v45 = vmul.f32 %v2345_v27, %v2237_v33  ;;  %v1813_v27 = vadd.f32 %v4452_v50, %v4942_v9  ;;  %v2007_v37 = vadd.f32 %v1960_v47, %v1814_v18  ;;  %v4944_v9 = vld [vmem:[#allocation64_spill] sm:$0xff] }
 0x5b3   : > { %v2301_v40 = vmul.f32 0.7978846, %v2289_v5  ;;  %v2274_v61 = vmul.f32 %v2262_v23, %v4435_v56  ;;  %v2275_v46 = vmul.f32 %v2263_v55, %v4447_v41  ;;  %v1766_v13 = vsel %vm1754_vm13, %v4478_v2, %v4460_v51 }
 0x5b4   : > { %v2742_v49 = vpack.i.bf16 %v2356_v4, %v2355_v3  ;;  %v2244_v3 = vmul.f32 0.5, %v4399_v35  ;;  %v2291_v35 = vadd.f32 %v2279_v16, %v4441_v36  ;;  %v2006_v30 = vadd.f32 %v4476_v42, %v1813_v27 }
 0x5b5   : > { %v4518_v38 = vpop.permute.xlu0 %1933  ;;  %v2276_v4 = vmul.f32 %v2264_v12, %v4449_v8  ;;  %2784 = vtanh.f32 %v2301_v40  ;;  %v2286_v62 = vadd.f32 %v2274_v61, %v4435_v56  ;;  %v1810_v55 = vadd.f32 %v4465_v20, %v4943_v32 }
 0x5b6   : > { %v4522_v53 = vpop.permute.xlu1 %1929  ;;  %2743 = vrot.lane.b32.xlu1 %v2742_v49, %s2887_s13  ;;  %v2340_v1 = vmul.f32 %v2328_v10, %v2244_v3  ;;  %v2303_v33 = vmul.f32 0.7978846, %v2291_v35  ;;  %v2341_v49 = vmul.f32 %v2329_v0, %v2245_v24  ;;  %v1926_v42 = vpop.permute.xlu2 %1925  ;;  %v1765_v35 = vsel %vm1754_vm13, %v4465_v20, %v4478_v2  ;;  %v4945_v2 = vld [vmem:[#allocation45_spill] sm:$0xff] }
 0x5b7   : > { %v2288_v14 = vadd.f32 %v2276_v4, %v4449_v8  ;;  %v2298_v59 = vmul.f32 0.7978846, %v2286_v62  ;;  %v1959_v12 = vsel %vm1947_vm15, %v4503_v34, %v4518_v38  ;;  %v1812_v27 = vadd.f32 %v1766_v13, %v4944_v9 }
 0x5b8   : > { %2786 = vtanh.f32 %v2303_v33  ;;  %v1958_v51 = vsel %vm1947_vm15, %v4522_v53, %v4503_v34  ;;  %v1811_v47 = vadd.f32 %v1765_v35, %v4945_v2  ;;  %v2241_v18 = vmul.f32 0.5, %v4427_v7 }
 0x5b9   : > { %2788 = vtanh.f32 %v2302_v25  ;;  %v2300_v48 = vmul.f32 0.7978846, %v2288_v14  ;;  %v2003_v38 = vadd.f32 %v4522_v53, %v1810_v55  ;;  %v2005_v40 = vadd.f32 %v1959_v12, %v1812_v27 }
 0x5ba   : > { %2790 = vtanh.f32 %v2298_v59  ;;  %v2243_v61 = vmul.f32 0.5, %v4441_v36  ;;  %v2004_v20 = vadd.f32 %v1958_v51, %v1811_v47  ;;  %v1764_v53 = vsel %vm1754_vm13, %v4224_v54, %v4506_v60 }
 0x5bb   : > { %v2785_v24 = vpop.eup %2784  ;;  %2792 = vtanh.f32 %v2300_v48  ;;  %v2238_v14 = vmul.f32 0.5, %v4435_v56  ;;  %v2239_v48 = vmul.f32 0.5, %v4447_v41 }
 0x5bc   : > { %v2325_v28 = vadd.f32 1.0, %v2785_v24 }
 0x5bd   : > { %v2166_v21 = vpop.permute.xlu0 %2165 }
 0x5be   : > { %v2162_v50 = vpop.permute.xlu1 %2161  ;;  %v2187_v11 = vsel %vm2173_vm0, %v2164_v26, %v2166_v21  ;;  %v2787_v15 = vpop.eup %2786  ;;  %v2337_v21 = vmul.f32 %v2325_v28, %v2241_v18 }
 0x5bf   : > { %v2186_v6 = vsel %vm2173_vm0, %v2162_v50, %v2164_v26  ;;  %v2232_v29 = vadd.f32 %v2162_v50, %v2006_v30  ;;  %v2234_v44 = vadd.f32 %v2187_v11, %v2008_v19  ;;  %v2287_v26 = vadd.f32 %v2275_v46, %v4447_v41  ;;  %v2158_v57 = vpop.permute.xlu2 %2157 }
 0x5c0   : > { %v2233_v43 = vadd.f32 %v2186_v6, %v2007_v37 }
 0x5c1   : > { %v2352_v16 = vmul.f32 %v2340_v1, %v2232_v29  ;;  %v2354_v22 = vmul.f32 %v2342_v17, %v2234_v44  ;;  %v2299_v52 = vmul.f32 0.7978846, %v2287_v26  ;;  %v2327_v1 = vadd.f32 1.0, %v2787_v15 }
 0x5c2   : > { %v2353_v10 = vmul.f32 %v2341_v49, %v2233_v43  ;;  %v2242_v17 = vmul.f32 0.5, %v4439_v39  ;;  %v4946_v43 = vld [vmem:[#allocation46_spill] sm:$0xff] }
 0x5c3   : > { %v2747_v31 = vpack.i.bf16 %v2352_v16, %v4514_v45  ;;  %v2789_v45 = vpop.eup %2788  ;;  %2794 = vtanh.f32 %v2299_v52  ;;  %v2339_v11 = vmul.f32 %v2327_v1, %v2243_v61  ;;  %v1809_v16 = vadd.f32 %v1764_v53, %v4946_v43  ;;  %v2359_v53 = vld [vmem:[%s4665_s3 + $0x8] sm:$0xff] }
 0x5c4   : > { %v2752_v3 = vpack.i.bf16 %v2354_v22, %v2353_v10  ;;  %v2326_v0 = vadd.f32 1.0, %v2789_v45  ;;  %v2791_v33 = vpop.eup %2790 }
 0x5c5   : > { %2748 = vrot.lane.b32.xlu2 %v2747_v31, %s2887_s13  ;;  %v1928_v23 = vpop.permute.xlu0 %1927  ;;  %v2793_v25 = vpop.eup %2792  ;;  %v2322_v49 = vadd.f32 1.0, %v2791_v33 }
 0x5c6   : > { %v1924_v5 = vpop.permute.xlu1 %1923  ;;  %2753 = vrot.lane.b32.xlu0 %v2752_v3, %s2887_s13  ;;  %v2338_v4 = vmul.f32 %v2326_v0, %v2242_v17  ;;  %v1957_v39 = vsel %vm1947_vm15, %v1926_v42, %v1928_v23  ;;  %v2324_v62 = vadd.f32 1.0, %v2793_v25  ;;  %v2240_v3 = vmul.f32 0.5, %v4449_v8 }
 0x5c7   : > { %v1956_v22 = vsel %vm1947_vm15, %v1924_v5, %v1926_v42  ;;  %v2000_v54 = vadd.f32 %v1924_v5, %v4228_v58  ;;  %v2152_v60 = vpop.permute.xlu2 %2151  ;;  %v2002_v26 = vadd.f32 %v1957_v39, %v1809_v16  ;;  %v2334_v15 = vmul.f32 %v2322_v49, %v2238_v14 }
 0x5c8   : > { %v2001_v23 = vadd.f32 %v1956_v22, %v4231_v63  ;;  %v2336_v13 = vmul.f32 %v2324_v62, %v2240_v3 }
 0x5c9   : > { %v2795_v6 = vpop.eup %2794 }
 0x5ca   : > { %v2323_v31 = vadd.f32 1.0, %v2795_v6 }
 0x5cc   : > { %v2335_v45 = vmul.f32 %v2323_v31, %v2239_v48 }
 0x5cd   : > { %v2160_v30 = vpop.permute.xlu0 %2159 }
 0x5ce   : > { %v2156_v19 = vpop.permute.xlu1 %2155  ;;  %v2185_v34 = vsel %vm2173_vm0, %v2158_v57, %v2160_v30 }
 0x5cf   : > { %v2184_v37 = vsel %vm2173_vm0, %v2156_v19, %v2158_v57  ;;  %v2229_v50 = vadd.f32 %v2156_v19, %v2003_v38  ;;  %v2231_v7 = vadd.f32 %v2185_v34, %v2005_v40 }
 0x5d0   : > { %v2230_v36 = vadd.f32 %v2184_v37, %v2004_v20 }
 0x5d1   : > { %v2349_v29 = vmul.f32 %v2337_v21, %v2229_v50  ;;  %v2351_v44 = vmul.f32 %v2339_v11, %v2231_v7  ;;  %v2358_v11 = vld [vmem:[%s4665_s3] sm:$0xff] }
 0x5d2   : > { %v2350_v46 = vmul.f32 %v2338_v4, %v2230_v36  ;;  %v2360_v36 = vld [vmem:[%s4665_s3 + $0x10] sm:$0xff]  ;;  %v2361_v4 = vld [vmem:[%s4665_s3 + $0x18] sm:$0xff] }
 0x5d4   : > { %v2757_v10 = vpack.i.bf16 %v2350_v46, %v2349_v29 }
 0x5d5   : > { %v2154_v59 = vpop.permute.xlu0 %2153 }
 0x5d6   : > { %v2150_v24 = vpop.permute.xlu1 %2149  ;;  %v2183_v42 = vsel %vm2173_vm0, %v2152_v60, %v2154_v59  ;;  %2758 = vrot.lane.b32.xlu1 %v2757_v10, %s2887_s13 }
 0x5d7   : > { %v2182_v56 = vsel %vm2173_vm0, %v2150_v24, %v2152_v60  ;;  %v2226_v52 = vadd.f32 %v2150_v24, %v2000_v54  ;;  %v2228_v58 = vadd.f32 %v2183_v42, %v2002_v26 }
 0x5d8   : > { %v2227_v5 = vadd.f32 %v2182_v56, %v2001_v23 }
 0x5d9   : > { %v2346_v35 = vmul.f32 %v2334_v15, %v2226_v52  ;;  %v2348_v8 = vmul.f32 %v2336_v13, %v2228_v58 }
 0x5da   : > { %v2347_v12 = vmul.f32 %v2335_v45, %v2227_v5 }
 0x5db   : > { %v2762_v28 = vpack.i.bf16 %v2346_v35, %v2351_v44 }
 0x5dc   : > { %v2767_v63 = vpack.i.bf16 %v2348_v8, %v2347_v12 }
 0x5dd   : > { %2763 = vrot.lane.b32.xlu2 %v2762_v28, %s2887_s13 }
 0x5de   : > { %2768 = vrot.lane.b32.xlu0 %v2767_v63, %s2887_s13  ;;  %s2504_s13 = scalar_lea.hbm %s4666_s4, %s2611_s10 }
 0x5df   : > { %s2507_s20 = sshll.u32 %s2504_s13, 4  ;;  %s2508_s20 = int_to_ptr.hbm [resolvable:$true] %s2507_s20 }
 0x5e0   : > { %s2818_s23 = sshra.s32 %s2508_s20, 4  ;;  %s2819_s23 = int_to_ptr.hbm [resolvable:$true] %s2818_s23 }
 0x5e1   : > { %s2820_s19 = scalar_lea.hbm %s2819_s23, 64  ;;  %p2825_p0 = scmp.lt.s32.totalorder %s2819_s23, %s4666_s4 }
 0x5e2   : > { %p2821_p11 = scmp.ne.s32.totalorder %s2819_s23, %s2820_s19  ;;  %p2826_p1 = scmp.lt.s32.totalorder %s2824_s29, %s2820_s19 }
 0x5e4   : > { %p2822_p12 = pnand %p2821_p11, %p2955_p5  ;;  %p2827_p2 = por %p2826_p1, %p2825_p0 }
 0x5e6   : > { %p2823_p13 = pneg %p2822_p12 }
 0x5e8   : > { %p2828_p3 = pnand %p2827_p2, %p2823_p13 }
 0x61f   : > { %v2749_v41 = vpop.permute.xlu2 %2748 }
 0x620   : > { %v2750_v32 = vunpack.i.l.bf16 %v2749_v41  ;;  %v2751_v2 = vunpack.i.h.bf16 %v2749_v41 }
 0x628   : > { %v2744_v1 = vpop.permute.xlu1 %2743 }
 0x629   : > { %v2746_v55 = vunpack.i.h.bf16 %v2744_v1  ;;  %v2745_v9 = vunpack.i.l.bf16 %v2744_v1 }
 0x62b   : > { %v2404_v27 = vsel %vm2016_vm14, %v2745_v9, %v2746_v55  ;;  %v2405_v51 = vsel %vm2016_vm14, %v2746_v55, %v2750_v32 }
 0x62c   : > { %2438 = vmatpush.msrb.mxu2 %v2404_v27  ;;  %2467 = vmatpush.msrb.mxu3 %v2405_v51 }
 0x637   : > { %v2764_v40 = vpop.permute.xlu2 %2763 }
 0x638   : > { %v2754_v57 = vpop.permute.xlu0 %2753  ;;  %v2765_v30 = vunpack.i.l.bf16 %v2764_v40  ;;  %v2766_v33 = vunpack.i.h.bf16 %v2764_v40 }
 0x639   : > { %v2756_v47 = vunpack.i.h.bf16 %v2754_v57  ;;  %v2755_v18 = vunpack.i.l.bf16 %v2754_v57 }
 0x63b   : > { %v2402_v0 = vsel %vm2016_vm14, %v2751_v2, %v2755_v18  ;;  %v2403_v38 = vsel %vm2016_vm14, %v2755_v18, %v2756_v47 }
 0x63c   : > { %2439 = vmatpush.msrb.mxu2 %v2402_v0  ;;  %2468 = vmatpush.msrb.mxu3 %v2403_v38 }
 0x648   : > { %v2759_v61 = vpop.permute.xlu1 %2758 }
 0x649   : > { %v2761_v20 = vunpack.i.h.bf16 %v2759_v61  ;;  %v2760_v19 = vunpack.i.l.bf16 %v2759_v61 }
 0x64b   : > { %v2400_v17 = vsel %vm2016_vm14, %v2760_v19, %v2761_v20  ;;  %v2401_v21 = vsel %vm2016_vm14, %v2761_v20, %v2765_v30 }
 0x64c   : > { %2440 = vmatpush.msrb.mxu2 %v2400_v17  ;;  %2469 = vmatpush.msrb.mxu3 %v2401_v21 }
 0x650   : > { %v2769_v34 = vpop.permute.xlu0 %2768 }
 0x651   : > { %v2771_v37 = vunpack.i.h.bf16 %v2769_v34  ;;  %v2770_v50 = vunpack.i.l.bf16 %v2769_v34 }
 0x653   : > { %v2398_v7 = vsel %vm2016_vm14, %v2766_v33, %v2770_v50  ;;  %v2399_v25 = vsel %vm2016_vm14, %v2770_v50, %v2771_v37 }
 0x654   : > { %2441 = vmatpush.msrb.mxu2 %v2398_v7  ;;  %2470 = vmatpush.msrb.mxu3 %v2399_v25 }
 0x655   : > { %2597 = vmatmul.msk.f32.vlgmr.msrb.gmra.mxu2 %vm212_vm2, %v2358_v11  ;;  %2601 = vmatmul.msk.f32.vlgmr.msrb.gmra.mxu3 %vm212_vm2, %v2358_v11 }
 0x65d   : > { %2598 = vmatmul.msk.f32.gmra.mxu2 %vm212_vm2, %v2359_v53  ;;  %2602 = vmatmul.msk.f32.gmra.mxu3 %vm212_vm2, %v2359_v53 }
 0x665   : > { %2599 = vmatmul.msk.f32.gmra.mxu2 %vm212_vm2, %v2360_v36  ;;  %2603 = vmatmul.msk.f32.gmra.mxu3 %vm212_vm2, %v2360_v36 }
 0x66d   : > { %2600 = vmatmul.msk.f32.gmra.mxu2 %vm212_vm2, %v2361_v4  ;;  %2604 = vmatmul.msk.f32.gmra.mxu3 %vm212_vm2, %v2361_v4 }
 0x6d8   : > { %v2443_v6 = vpop.f32.mrf.mxu2  ;;  %v2472_v29 = vpop.f32.mrf.mxu3 }
 0x6d9   : > { %2484 = vst [vmem:[%s190_s9] sm:$0xff] %v2443_v6 }
 0x6da   : > { %2485 = vst [vmem:[%s190_s9 + $0x8] sm:$0xff] %v2472_v29 }
 0x6e0   : > { %v2446_v44 = vpop.f32.mrf.mxu2  ;;  %v2475_v39 = vpop.f32.mrf.mxu3 }
 0x6e1   : > { %2486 = vst [vmem:[%s190_s9 + $0x10] sm:$0xff] %v2446_v44 }
 0x6e2   : > { %2487 = vst [vmem:[%s190_s9 + $0x18] sm:$0xff] %v2475_v39 }
 0x6e8   : > { %v2449_v46 = vpop.f32.mrf.mxu2  ;;  %v2478_v49 = vpop.f32.mrf.mxu3 }
 0x6e9   : > { %2488 = vst [vmem:[%s190_s9 + $0x20] sm:$0xff] %v2449_v46 }
 0x6ea   : > { %2489 = vst [vmem:[%s190_s9 + $0x28] sm:$0xff] %v2478_v49 }
 0x6f0   : > { %v2452_v43 = vpop.f32.mrf.mxu2  ;;  %v2481_v16 = vpop.f32.mrf.mxu3 }
 0x6f1   : > { %2490 = vst [vmem:[%s190_s9 + $0x30] sm:$0xff] %v2452_v43 }
 0x6f2   : > { %2491 = vst [vmem:[%s190_s9 + $0x38] sm:$0xff] %v2481_v16 }
 0x6f3   : > { %2831 = shalt.err (!%p2828_p3)
}
 0x6f4   : > { %s2890_s6 = smov 256   ;;  %s2891_s7 = smov 16  }
 0x6f5   : > { %2620 = dma.vmem_to_hbm [thread:$0]  (%p2955_p5), %s2506_s14, 1024, %s2508_s20, %s2493_s22, %s2890_s6, %s2890_s6, %s2891_s7  }
 0x6f6 PF: > { %p2626_p4 = scmp.ge.s32.totalorder %s2866_s18, 2  ;;  %s2522_s8 = sand.u32 1, %s2854_s15  }
 0x6f7   : > { %s2523_s9 = scalar_lea.sflag [#allocation4], %s2522_s8 }
 0x6f8   : > { %p2623_p7 = pnand %p2626_p4, %p2959_p6 }
 0x6fa   : > { %p2624_p8 = pneg %p2623_p7 }
 0x6fc   : > { %2849 = dma.done.wait (%p2624_p8), %s2523_s9, 1024  }
 0x6fd   : > { %2851 = vsyncadd (%p2624_p8), %s2523_s9, 4294966272  ;;  %p14_p9 = scmp.ge.s32.totalorder %s2942_s21, 4   ;;  %s4947_s15 = smov %s2858_s16 }
 0x6fe   : > { %s4948_s16 = smov %s2862_s17  ;;  %s4949_s17 = smov %s2953_s24 }
 0x6ff   : > { %s4950_s18 = smov %s2942_s21  ;;  %16 = sbr.rel (!%p14_p9) target bundleno = 3 (0x3), region = 71 }
 0x704   :  { %2529 = vsyncpa [#allocation4], 1 }
 0x705   :  { %2531 = vsyncpa [#allocation4 + $0x1], 1 }

</bundles_post_ra>
